<compile_context>
chip_gen: v5e
topology: v5e:2x2
jax: 0.10.0
libtpu: 0.0.40
codegen_flags: <defaults>
</compile_context>

<pallas_src>
import jax
import jax.numpy as jnp
from jax.experimental import pallas as pl
from jax.experimental.pallas import tpu as pltpu


# ----------------------------------------------------------------------------
# Fused kernel: bidirectional LSTM over the (packed) context + all 4 heads.
# ----------------------------------------------------------------------------
def nel_fused_kernel(xcat_ref, len_ref, mention_ref, ent_ref,
                     wih_ref, whh_ref, blstm_ref,
                     w1h_ref, wA_ref, wB_ref, bhead_ref,
                     out_ref):
    TB = xcat_ref.shape[0]
    B = len_ref.shape[0]
    T = TB // B
    H = w1h_ref.shape[0]
    H2, H4, H6, H8 = 2 * H, 4 * H, 6 * H, 8 * H

    lens = len_ref[...]                                   # (B, 1) int32

    # ---- Hoisted input projection (both directions, all T steps, 1 matmul) --
    # Column layout: [i_f i_b f_f f_b o_f o_b g_f g_b]; the backward-direction
    # columns already see the time-reversed context (xcat = [x | rev_t(x)]).
    z_in = (jnp.dot(xcat_ref[...], wih_ref[...],
                    preferred_element_type=jnp.float32)
            + blstm_ref[...])                             # (T*B, 8H)

    whh = whh_ref[...]                                    # (2H, 8H) block-diag

    # ---- Precompute all packed-sequence masks once (no per-step broadcasts) -
    # Forward state cols [0:H] valid while lens > t; backward cols [H:2H] valid
    # while lens > (T-1-t).  Only equivalent to pack_padded_sequence because
    # the initial h/c are zero.
    col = jax.lax.broadcasted_iota(jnp.int32, (T, 1, H2), 2)
    stp = jax.lax.broadcasted_iota(jnp.int32, (T, 1, H2), 0)
    tsel = jnp.where(col < H, stp, (T - 1) - stp)         # (T, 1, 2H)
    mask_all = lens.reshape(1, B, 1) > tsel               # (T, B, 2H) bool

    h = jnp.zeros((B, H2), jnp.float32)                   # [h_f | h_b]
    c = jnp.zeros((B, H2), jnp.float32)                   # [c_f | c_b]

    # Fully unrolled recurrence with static indices; fine at T=8.
    # TODO(synk): for T >~ 32 switch to lax.fori_loop(unroll=2..4) over
    #             z_in[pl.ds(...)] slices to bound code size / vreg pressure,
    #             and chunk the hoisted projection over T (v7x has only 64 MiB
    #             VMEM / 32 MiB default scoped limit).
    for t in range(T):
        # Single block-diagonal recurrent matmul covers both directions.
        z = z_in[t * B:(t + 1) * B, :] + jnp.dot(
            h, whh, preferred_element_type=jnp.float32)   # (B, 8H)
        zs = jax.nn.sigmoid(z[:, 0:H6])                   # i|f|o, both dirs
        g = jnp.tanh(z[:, H6:H8])                         # g, both dirs
        c_new = zs[:, H2:H4] * c + zs[:, 0:H2] * g
        h_new = zs[:, H4:H6] * jnp.tanh(c_new)
        m = mask_all[t]                                   # (B, 2H), reused
        h = jnp.where(m, h_new, h)
        c = jnp.where(m, c_new, c)

    # torch.mean(h_n, dim=0) over the 2 directions.
    h_mean = 0.5 * (h[:, 0:H] + h[:, H:H2])               # (B, H)

    # ---- Heads: all first-layer matmuls batched into one, ditto second ------
    b1 = bhead_ref[:, 0:H]
    b11 = bhead_ref[:, H:H2]
    b2 = bhead_ref[:, H2:3 * H]
    b22 = bhead_ref[:, 3 * H:H4]

    m_mean = jnp.mean(mention_ref[...], axis=0)           # (B, E)
    ent_means = jnp.mean(ent_ref[...], axis=0)            # (3B, E): te|c1|c2
    all_means = jnp.concatenate([m_mean, ent_means], axis=0)   # (4B, E)

    first = jnp.dot(all_means, wA_ref[...],
                    preferred_element_type=jnp.float32)   # (4B, 2H): [w1m|w2]
    cm_h = jnp.maximum(
        jnp.dot(h_mean, w1h_ref[...], preferred_element_type=jnp.float32)
        + first[0:B, 0:H] + b1, 0.0)                      # relu(lin_1)
    ent_h = jnp.maximum(first[B:4 * B, H:H2] + b2, 0.0)   # relu(lin_2)

    stacked = jnp.concatenate([cm_h, ent_h], axis=0)      # (4B, H)
    second = jnp.dot(stacked, wB_ref[...],
                     preferred_element_type=jnp.float32)  # (4B, 2H): [w11|w22]
    cm = second[0:B, 0:H] + b11                           # (B, H)
    ent_out = second[B:4 * B, H:H2] + b22                 # (3B, H)

    # ---- lane-dense output slab: (B, 4H) = [cm | te | c1 | c2] --------------
    out_ref[...] = jnp.concatenate(
        [cm, ent_out[0:B], ent_out[B:2 * B], ent_out[2 * B:3 * B]], axis=1)


# ----------------------------------------------------------------------------
# Wrapper
# ----------------------------------------------------------------------------
def nel_forward(params, context, context_lengths, mention,
                true_entity, candidate_1, candidate_2):
    T, B, E = context.shape
    H = params["w11"].shape[0]

    # Pad batch to a multiple of 8 (sublane tile). Padded rows get length 0 so
    # their LSTM state stays zero; their head outputs are discarded at the end.
    Bp = ((B + 7) // 8) * 8
    pb = Bp - B
    if pb:
        pad3 = lambda a: jnp.pad(a, ((0, 0), (0, pb), (0, 0)))
        context = pad3(context)
        mention = pad3(mention)
        true_entity = pad3(true_entity)
        candidate_1 = pad3(candidate_1)
        candidate_2 = pad3(candidate_2)
        context_lengths = jnp.pad(context_lengths, (0, pb))

    lens2d = context_lengths.reshape(Bp, 1).astype(jnp.int32)

    # context + time-reversed context side by side -> ONE hoisted input matmul
    # yields both directions' gate pre-activations with no per-step reindexing.
    xcat = jnp.concatenate(
        [context.reshape(T * Bp, E),
         jnp.flip(context, axis=0).reshape(T * Bp, E)], axis=1)   # (T*Bp, 2E)

    # Entities stacked along batch: [true_entity | candidate_1 | candidate_2].
    ent_stack = jnp.concatenate(
        [true_entity, candidate_1, candidate_2], axis=1)          # (T_e, 3Bp, E)

    # ---- LSTM weights in kernel layout --------------------------------------
    # Params store per-direction weights with PyTorch gate order [i, f, g, o].
    # Kernel column order (8 H-wide blocks): i_f i_b f_f f_b o_f o_b g_f g_b
    #   -> one sigmoid pass over cols [0:6H], one tanh pass over [6H:8H].
    def gate_col(w, g):
        k = {"i": 0, "f": 1, "g": 2, "o": 3}[g]
        return w[:, k * H:(k + 1) * H]

    def dir_block(wf, wb, g, rows):
        z = jnp.zeros((rows, H), jnp.float32)
        top = jnp.concatenate([gate_col(wf, g), z], axis=1)
        bot = jnp.concatenate([z, gate_col(wb, g)], axis=1)
        return jnp.concatenate([top, bot], axis=0)                # (2*rows, 2H)

    gate_order = ("i", "f", "o", "g")
    wih_k = jnp.concatenate(
        [dir_block(params["wih_f"], params["wih_b"], g, E) for g in gate_order],
        axis=1)                                                   # (2E, 8H)
    whh_k = jnp.concatenate(
        [dir_block(params["whh_f"], params["whh_b"], g, H) for g in gate_order],
        axis=1)                                                   # (2H, 8H)
    b_k = jnp.concatenate(
        [jnp.concatenate([gate_col(params["b_f"], g),
                          gate_col(params["b_b"], g)], axis=1)
         for g in gate_order], axis=1)                            # (1, 8H)

    # ---- Head weights packed into lane-dense slabs --------------------------
    wA = jnp.concatenate([params["w1m"], params["w2"]], axis=1)   # (E, 2H)
    wB = jnp.concatenate([params["w11"], params["w22"]], axis=1)  # (H, 2H)
    bhead = jnp.concatenate([params["b1"], params["b11"],
                             params["b2"], params["b22"]], axis=1)  # (1, 4H)

    vmem = pl.BlockSpec(memory_space=pltpu.MemorySpace.VMEM)
    out = pl.pallas_call(
        nel_fused_kernel,
        out_shape=jax.ShapeDtypeStruct((Bp, 4 * H), jnp.float32),
        in_specs=[vmem] * 11,
        out_specs=vmem,
    )(xcat, lens2d, mention, ent_stack,
      wih_k, whh_k, b_k, params["w1h"], wA, wB, bhead)

    cm = out[:B, 0:H]
    te = out[:B, H:2 * H]
    c1 = out[:B, 2 * H:3 * H]
    c2 = out[:B, 3 * H:4 * H]
    return cm, te, c1, c2


# ----------------------------------------------------------------------------
# Pure-JAX reference (for correctness check)
# ----------------------------------------------------------------------------
def nel_forward_ref(params, context, context_lengths, mention,
                    true_entity, candidate_1, candidate_2):
    T, B, E = context.shape
    H = params["w11"].shape[0]
    lengths = context_lengths.astype(jnp.int32)

    def run_dir(wih, whh, b, reverse):
        h = jnp.zeros((B, H), jnp.float32)
        c = jnp.zeros((B, H), jnp.float32)
        ts = range(T - 1, -1, -1) if reverse else range(T)
        for t in ts:
            x_t = context[t]
            z = x_t @ wih + h @ whh + b
            i = jax.nn.sigmoid(z[:, :H])
            f = jax.nn.sigmoid(z[:, H:2 * H])
            g = jnp.tanh(z[:, 2 * H:3 * H])
            o = jax.nn.sigmoid(z[:, 3 * H:])
            c_new = f * c + i * g
            h_new = o * jnp.tanh(c_new)
            mask = (t < lengths).astype(jnp.float32)[:, None]
            h = mask * h_new + (1 - mask) * h
            c = mask * c_new + (1 - mask) * c
        return h

    h_f = run_dir(params["wih_f"], params["whh_f"], params["b_f"], False)
    h_b = run_dir(params["wih_b"], params["whh_b"], params["b_b"], True)
    hm = 0.5 * (h_f + h_b)
    m_mean = mention.mean(0)
    cm = (jnp.maximum(hm @ params["w1h"] + m_mean @ params["w1m"] + params["b1"], 0.0)
          @ params["w11"] + params["b11"])

    def ent(x):
        xm = x.mean(0)
        return (jnp.maximum(xm @ params["w2"] + params["b2"], 0.0)
                @ params["w22"] + params["b22"])

    return cm, ent(true_entity), ent(candidate_1), ent(candidate_2)


# ----------------------------------------------------------------------------
# Deterministic parameter init (PyTorch-style uniform ranges, synthetic values)
# ----------------------------------------------------------------------------
def init_params(key, embedding_dim, hidden_size):
    E, H = embedding_dim, hidden_size
    ks = jax.random.split(key, 20)
    klstm = 1.0 / jnp.sqrt(H)

    def u(k, shape, bound):
        return jax.random.uniform(k, shape, jnp.float32, -bound, bound)

    params = {
        # LSTM (weights stored pre-transposed: x @ W_ih^T -> (E, 4H), torch
        # gate order [i, f, g, o])
        "wih_f": u(ks[0], (E, 4 * H), klstm),
        "whh_f": u(ks[1], (H, 4 * H), klstm),
        "b_f":   u(ks[2], (1, 4 * H), klstm) + u(ks[3], (1, 4 * H), klstm),
        "wih_b": u(ks[4], (E, 4 * H), klstm),
        "whh_b": u(ks[5], (H, 4 * H), klstm),
        "b_b":   u(ks[6], (1, 4 * H), klstm) + u(ks[7], (1, 4 * H), klstm),
        # lin_1: (H+E) -> H, split into hidden-part and mention-part
        "w1h": u(ks[8], (H, H), 1.0 / jnp.sqrt(H + E)),
        "w1m": u(ks[9], (E, H), 1.0 / jnp.sqrt(H + E)),
        "b1":  u(ks[10], (1, H), 1.0 / jnp.sqrt(H + E)),
        # lin_1_1: H -> H
        "w11": u(ks[11], (H, H), 1.0 / jnp.sqrt(H)),
        "b11": u(ks[12], (1, H), 1.0 / jnp.sqrt(H)),
        # lin_2: E -> H
        "w2": u(ks[13], (E, H), 1.0 / jnp.sqrt(E)),
        "b2": u(ks[14], (1, H), 1.0 / jnp.sqrt(E)),
        # lin_2_2: H -> H
        "w22": u(ks[15], (H, H), 1.0 / jnp.sqrt(H)),
        "b22": u(ks[16], (1, H), 1.0 / jnp.sqrt(H)),
    }
    return params


if __name__ == "__main__":
    E, H = 32, 32           # embedding_dim, hidden_size
    B = 8                   # batch
    T_ctx, T_m, T_e = 8, 4, 4

    key = jax.random.PRNGKey(0)
    kp, kc, km, kt, k1, k2 = jax.random.split(key, 6)
    params = init_params(kp, E, H)

    context = jax.random.normal(kc, (T_ctx, B, E), jnp.float32)
    context_lengths = jnp.array([8, 8, 7, 6, 8, 5, 8, 3], jnp.int32)
    mention = jax.random.normal(km, (T_m, B, E), jnp.float32)
    true_entity = jax.random.normal(kt, (T_e, B, E), jnp.float32)
    candidate_1 = jax.random.normal(k1, (T_e, B, E), jnp.float32)
    candidate_2 = jax.random.normal(k2, (T_e, B, E), jnp.float32)

    outs = nel_forward(params, context, context_lengths, mention,
                       true_entity, candidate_1, candidate_2)
    outs = jax.block_until_ready(outs)

    refs = nel_forward_ref(params, context, context_lengths, mention,
                           true_entity, candidate_1, candidate_2)
    for o, r in zip(outs, refs):
        assert o.shape == (B, H)
        assert jnp.allclose(o, r, rtol=1e-4, atol=1e-4)

    # Also exercise the batch-padding path (B=5, not a multiple of 8).
    Bs = 5
    outs_s = nel_forward(params, context[:, :Bs], context_lengths[:Bs],
                         mention[:, :Bs], true_entity[:, :Bs],
                         candidate_1[:, :Bs], candidate_2[:, :Bs])
    outs_s = jax.block_until_ready(outs_s)
    refs_s = nel_forward_ref(params, context[:, :Bs], context_lengths[:Bs],
                             mention[:, :Bs], true_entity[:, :Bs],
                             candidate_1[:, :Bs], candidate_2[:, :Bs])
    for o, r in zip(outs_s, refs_s):
        assert o.shape == (Bs, H)
        assert jnp.allclose(o, r, rtol=1e-4, atol=1e-4)

    print("KERNEL_OK")
</pallas_src>

<mosaic_0001>
module attributes {stable_mosaic.version = 11 : i64} {
  func.func @nel_fused_kernel(%arg0: memref<64x64xf32, #tpu.memory_space<vmem>>, %arg1: memref<8x1xi32, #tpu.memory_space<vmem>>, %arg2: memref<4x8x32xf32, #tpu.memory_space<vmem>>, %arg3: memref<4x24x32xf32, #tpu.memory_space<vmem>>, %arg4: memref<64x256xf32, #tpu.memory_space<vmem>>, %arg5: memref<64x256xf32, #tpu.memory_space<vmem>>, %arg6: memref<1x256xf32, #tpu.memory_space<vmem>>, %arg7: memref<32x32xf32, #tpu.memory_space<vmem>>, %arg8: memref<32x64xf32, #tpu.memory_space<vmem>>, %arg9: memref<32x64xf32, #tpu.memory_space<vmem>>, %arg10: memref<1x128xf32, #tpu.memory_space<vmem>>, %arg11: memref<8x128xf32, #tpu.memory_space<vmem>>) attributes {dimension_semantics = [], scalar_prefetch = 0 : i64, scratch_operands = 0 : i64, tpu.core_type = #tpu.core_type<tc>} {
    %c0 = arith.constant 0 : index
    %c0_0 = arith.constant 0 : index
    %0 = vector.load %arg1[%c0, %c0_0] : memref<8x1xi32, #tpu.memory_space<vmem>>, vector<8x1xi32>
    %c0_1 = arith.constant 0 : index
    %c0_2 = arith.constant 0 : index
    %1 = vector.load %arg0[%c0_1, %c0_2] : memref<64x64xf32, #tpu.memory_space<vmem>>, vector<64x64xf32>
    %c0_3 = arith.constant 0 : index
    %c0_4 = arith.constant 0 : index
    %2 = vector.load %arg4[%c0_3, %c0_4] : memref<64x256xf32, #tpu.memory_space<vmem>>, vector<64x256xf32>
    %cst = arith.constant dense<0.000000e+00> : vector<64x256xf32>
    %3 = tpu.matmul %1, %2, %cst {dimension_numbers = #tpu.dot_dimension_numbers<[1], [0], [0], [1], [0, 0, 1, 1], [], []>} : vector<64x64xf32>, vector<64x256xf32>, vector<64x256xf32> -> vector<64x256xf32>
    %c0_5 = arith.constant 0 : index
    %c0_6 = arith.constant 0 : index
    %4 = vector.load %arg6[%c0_5, %c0_6] : memref<1x256xf32, #tpu.memory_space<vmem>>, vector<1x256xf32>
    %5 = vector.broadcast %4 : vector<1x256xf32> to vector<64x256xf32>
    %6 = arith.addf %3, %5 : vector<64x256xf32>
    %c0_7 = arith.constant 0 : index
    %c0_8 = arith.constant 0 : index
    %7 = vector.load %arg5[%c0_7, %c0_8] : memref<64x256xf32, #tpu.memory_space<vmem>>, vector<64x256xf32>
    %8 = tpu.iota {dimensions = array<i32: 2>} : vector<8x1x64xi32>
    %9 = tpu.iota {dimensions = array<i32: 0>} : vector<8x1x64xi32>
    %c32_i32 = arith.constant 32 : i32
    %10 = vector.broadcast %c32_i32 : i32 to vector<8x1x64xi32>
    %11 = arith.cmpi slt, %8, %10 : vector<8x1x64xi32>
    %c7_i32 = arith.constant 7 : i32
    %12 = vector.broadcast %c7_i32 : i32 to vector<8x1x64xi32>
    %13 = arith.subi %12, %9 : vector<8x1x64xi32>
    %14 = arith.select %11, %9, %13 : vector<8x1x64xi1>, vector<8x1x64xi32>
    %15 = vector.shape_cast %0 : vector<8x1xi32> to vector<1x8x1xi32>
    %16 = vector.broadcast %15 : vector<1x8x1xi32> to vector<8x8x64xi32>
    %17 = vector.broadcast %14 : vector<8x1x64xi32> to vector<8x8x64xi32>
    %18 = arith.cmpi sgt, %16, %17 : vector<8x8x64xi32>
    %cst_9 = arith.constant 0.000000e+00 : f32
    %19 = vector.broadcast %cst_9 : f32 to vector<8x64xf32>
    %cst_10 = arith.constant 0.000000e+00 : f32
    %20 = vector.broadcast %cst_10 : f32 to vector<8x64xf32>
    %21 = vector.extract_strided_slice %6 {offsets = [0, 0], sizes = [8, 256], strides = [1, 1]} : vector<64x256xf32> to vector<8x256xf32>
    %cst_11 = arith.constant dense<0.000000e+00> : vector<8x256xf32>
    %22 = tpu.matmul %19, %7, %cst_11 {dimension_numbers = #tpu.dot_dimension_numbers<[1], [0], [0], [1], [0, 0, 1, 1], [], []>} : vector<8x64xf32>, vector<64x256xf32>, vector<8x256xf32> -> vector<8x256xf32>
    %23 = arith.addf %21, %22 : vector<8x256xf32>
    %24 = vector.extract_strided_slice %23 {offsets = [0, 0], sizes = [8, 192], strides = [1, 1]} : vector<8x256xf32> to vector<8x192xf32>
    %25 = arith.negf %24 : vector<8x192xf32>
    %26 = math.exp %25 : vector<8x192xf32>
    %cst_12 = arith.constant 1.000000e+00 : f32
    %27 = vector.broadcast %cst_12 : f32 to vector<8x192xf32>
    %28 = arith.addf %27, %26 : vector<8x192xf32>
    %29 = arith.divf %27, %28 : vector<8x192xf32>
    %30 = vector.extract_strided_slice %23 {offsets = [0, 192], sizes = [8, 64], strides = [1, 1]} : vector<8x256xf32> to vector<8x64xf32>
    %31 = math.tanh %30 : vector<8x64xf32>
    %32 = vector.extract_strided_slice %29 {offsets = [0, 64], sizes = [8, 64], strides = [1, 1]} : vector<8x192xf32> to vector<8x64xf32>
    %33 = arith.mulf %32, %20 : vector<8x64xf32>
    %34 = vector.extract_strided_slice %29 {offsets = [0, 0], sizes = [8, 64], strides = [1, 1]} : vector<8x192xf32> to vector<8x64xf32>
    %35 = arith.mulf %34, %31 : vector<8x64xf32>
    %36 = arith.addf %33, %35 : vector<8x64xf32>
    %37 = vector.extract_strided_slice %29 {offsets = [0, 128], sizes = [8, 64], strides = [1, 1]} : vector<8x192xf32> to vector<8x64xf32>
    %38 = math.tanh %36 : vector<8x64xf32>
    %39 = arith.mulf %37, %38 : vector<8x64xf32>
    %40 = vector.extract_strided_slice %18 {offsets = [0, 0, 0], sizes = [1, 8, 64], strides = [1, 1, 1]} : vector<8x8x64xi1> to vector<1x8x64xi1>
    %41 = vector.shape_cast %40 : vector<1x8x64xi1> to vector<8x64xi1>
    %42 = arith.select %41, %39, %19 : vector<8x64xi1>, vector<8x64xf32>
    %43 = arith.select %41, %36, %20 : vector<8x64xi1>, vector<8x64xf32>
    %44 = vector.extract_strided_slice %6 {offsets = [8, 0], sizes = [8, 256], strides = [1, 1]} : vector<64x256xf32> to vector<8x256xf32>
    %cst_13 = arith.constant dense<0.000000e+00> : vector<8x256xf32>
    %45 = tpu.matmul %42, %7, %cst_13 {dimension_numbers = #tpu.dot_dimension_numbers<[1], [0], [0], [1], [0, 0, 1, 1], [], []>} : vector<8x64xf32>, vector<64x256xf32>, vector<8x256xf32> -> vector<8x256xf32>
    %46 = arith.addf %44, %45 : vector<8x256xf32>
    %47 = vector.extract_strided_slice %46 {offsets = [0, 0], sizes = [8, 192], strides = [1, 1]} : vector<8x256xf32> to vector<8x192xf32>
    %48 = arith.negf %47 : vector<8x192xf32>
    %49 = math.exp %48 : vector<8x192xf32>
    %cst_14 = arith.constant 1.000000e+00 : f32
    %50 = vector.broadcast %cst_14 : f32 to vector<8x192xf32>
    %51 = arith.addf %50, %49 : vector<8x192xf32>
    %52 = arith.divf %50, %51 : vector<8x192xf32>
    %53 = vector.extract_strided_slice %46 {offsets = [0, 192], sizes = [8, 64], strides = [1, 1]} : vector<8x256xf32> to vector<8x64xf32>
    %54 = math.tanh %53 : vector<8x64xf32>
    %55 = vector.extract_strided_slice %52 {offsets = [0, 64], sizes = [8, 64], strides = [1, 1]} : vector<8x192xf32> to vector<8x64xf32>
    %56 = arith.mulf %55, %43 : vector<8x64xf32>
    %57 = vector.extract_strided_slice %52 {offsets = [0, 0], sizes = [8, 64], strides = [1, 1]} : vector<8x192xf32> to vector<8x64xf32>
    %58 = arith.mulf %57, %54 : vector<8x64xf32>
    %59 = arith.addf %56, %58 : vector<8x64xf32>
    %60 = vector.extract_strided_slice %52 {offsets = [0, 128], sizes = [8, 64], strides = [1, 1]} : vector<8x192xf32> to vector<8x64xf32>
    %61 = math.tanh %59 : vector<8x64xf32>
    %62 = arith.mulf %60, %61 : vector<8x64xf32>
    %63 = vector.extract_strided_slice %18 {offsets = [1, 0, 0], sizes = [1, 8, 64], strides = [1, 1, 1]} : vector<8x8x64xi1> to vector<1x8x64xi1>
    %64 = vector.shape_cast %63 : vector<1x8x64xi1> to vector<8x64xi1>
    %65 = arith.select %64, %62, %42 : vector<8x64xi1>, vector<8x64xf32>
    %66 = arith.select %64, %59, %43 : vector<8x64xi1>, vector<8x64xf32>
    %67 = vector.extract_strided_slice %6 {offsets = [16, 0], sizes = [8, 256], strides = [1, 1]} : vector<64x256xf32> to vector<8x256xf32>
    %cst_15 = arith.constant dense<0.000000e+00> : vector<8x256xf32>
    %68 = tpu.matmul %65, %7, %cst_15 {dimension_numbers = #tpu.dot_dimension_numbers<[1], [0], [0], [1], [0, 0, 1, 1], [], []>} : vector<8x64xf32>, vector<64x256xf32>, vector<8x256xf32> -> vector<8x256xf32>
    %69 = arith.addf %67, %68 : vector<8x256xf32>
    %70 = vector.extract_strided_slice %69 {offsets = [0, 0], sizes = [8, 192], strides = [1, 1]} : vector<8x256xf32> to vector<8x192xf32>
    %71 = arith.negf %70 : vector<8x192xf32>
    %72 = math.exp %71 : vector<8x192xf32>
    %cst_16 = arith.constant 1.000000e+00 : f32
    %73 = vector.broadcast %cst_16 : f32 to vector<8x192xf32>
    %74 = arith.addf %73, %72 : vector<8x192xf32>
    %75 = arith.divf %73, %74 : vector<8x192xf32>
    %76 = vector.extract_strided_slice %69 {offsets = [0, 192], sizes = [8, 64], strides = [1, 1]} : vector<8x256xf32> to vector<8x64xf32>
    %77 = math.tanh %76 : vector<8x64xf32>
    %78 = vector.extract_strided_slice %75 {offsets = [0, 64], sizes = [8, 64], strides = [1, 1]} : vector<8x192xf32> to vector<8x64xf32>
    %79 = arith.mulf %78, %66 : vector<8x64xf32>
    %80 = vector.extract_strided_slice %75 {offsets = [0, 0], sizes = [8, 64], strides = [1, 1]} : vector<8x192xf32> to vector<8x64xf32>
    %81 = arith.mulf %80, %77 : vector<8x64xf32>
    %82 = arith.addf %79, %81 : vector<8x64xf32>
    %83 = vector.extract_strided_slice %75 {offsets = [0, 128], sizes = [8, 64], strides = [1, 1]} : vector<8x192xf32> to vector<8x64xf32>
    %84 = math.tanh %82 : vector<8x64xf32>
    %85 = arith.mulf %83, %84 : vector<8x64xf32>
    %86 = vector.extract_strided_slice %18 {offsets = [2, 0, 0], sizes = [1, 8, 64], strides = [1, 1, 1]} : vector<8x8x64xi1> to vector<1x8x64xi1>
    %87 = vector.shape_cast %86 : vector<1x8x64xi1> to vector<8x64xi1>
    %88 = arith.select %87, %85, %65 : vector<8x64xi1>, vector<8x64xf32>
    %89 = arith.select %87, %82, %66 : vector<8x64xi1>, vector<8x64xf32>
    %90 = vector.extract_strided_slice %6 {offsets = [24, 0], sizes = [8, 256], strides = [1, 1]} : vector<64x256xf32> to vector<8x256xf32>
    %cst_17 = arith.constant dense<0.000000e+00> : vector<8x256xf32>
    %91 = tpu.matmul %88, %7, %cst_17 {dimension_numbers = #tpu.dot_dimension_numbers<[1], [0], [0], [1], [0, 0, 1, 1], [], []>} : vector<8x64xf32>, vector<64x256xf32>, vector<8x256xf32> -> vector<8x256xf32>
    %92 = arith.addf %90, %91 : vector<8x256xf32>
    %93 = vector.extract_strided_slice %92 {offsets = [0, 0], sizes = [8, 192], strides = [1, 1]} : vector<8x256xf32> to vector<8x192xf32>
    %94 = arith.negf %93 : vector<8x192xf32>
    %95 = math.exp %94 : vector<8x192xf32>
    %cst_18 = arith.constant 1.000000e+00 : f32
    %96 = vector.broadcast %cst_18 : f32 to vector<8x192xf32>
    %97 = arith.addf %96, %95 : vector<8x192xf32>
    %98 = arith.divf %96, %97 : vector<8x192xf32>
    %99 = vector.extract_strided_slice %92 {offsets = [0, 192], sizes = [8, 64], strides = [1, 1]} : vector<8x256xf32> to vector<8x64xf32>
    %100 = math.tanh %99 : vector<8x64xf32>
    %101 = vector.extract_strided_slice %98 {offsets = [0, 64], sizes = [8, 64], strides = [1, 1]} : vector<8x192xf32> to vector<8x64xf32>
    %102 = arith.mulf %101, %89 : vector<8x64xf32>
    %103 = vector.extract_strided_slice %98 {offsets = [0, 0], sizes = [8, 64], strides = [1, 1]} : vector<8x192xf32> to vector<8x64xf32>
    %104 = arith.mulf %103, %100 : vector<8x64xf32>
    %105 = arith.addf %102, %104 : vector<8x64xf32>
    %106 = vector.extract_strided_slice %98 {offsets = [0, 128], sizes = [8, 64], strides = [1, 1]} : vector<8x192xf32> to vector<8x64xf32>
    %107 = math.tanh %105 : vector<8x64xf32>
    %108 = arith.mulf %106, %107 : vector<8x64xf32>
    %109 = vector.extract_strided_slice %18 {offsets = [3, 0, 0], sizes = [1, 8, 64], strides = [1, 1, 1]} : vector<8x8x64xi1> to vector<1x8x64xi1>
    %110 = vector.shape_cast %109 : vector<1x8x64xi1> to vector<8x64xi1>
    %111 = arith.select %110, %108, %88 : vector<8x64xi1>, vector<8x64xf32>
    %112 = arith.select %110, %105, %89 : vector<8x64xi1>, vector<8x64xf32>
    %113 = vector.extract_strided_slice %6 {offsets = [32, 0], sizes = [8, 256], strides = [1, 1]} : vector<64x256xf32> to vector<8x256xf32>
    %cst_19 = arith.constant dense<0.000000e+00> : vector<8x256xf32>
    %114 = tpu.matmul %111, %7, %cst_19 {dimension_numbers = #tpu.dot_dimension_numbers<[1], [0], [0], [1], [0, 0, 1, 1], [], []>} : vector<8x64xf32>, vector<64x256xf32>, vector<8x256xf32> -> vector<8x256xf32>
    %115 = arith.addf %113, %114 : vector<8x256xf32>
    %116 = vector.extract_strided_slice %115 {offsets = [0, 0], sizes = [8, 192], strides = [1, 1]} : vector<8x256xf32> to vector<8x192xf32>
    %117 = arith.negf %116 : vector<8x192xf32>
    %118 = math.exp %117 : vector<8x192xf32>
    %cst_20 = arith.constant 1.000000e+00 : f32
    %119 = vector.broadcast %cst_20 : f32 to vector<8x192xf32>
    %120 = arith.addf %119, %118 : vector<8x192xf32>
    %121 = arith.divf %119, %120 : vector<8x192xf32>
    %122 = vector.extract_strided_slice %115 {offsets = [0, 192], sizes = [8, 64], strides = [1, 1]} : vector<8x256xf32> to vector<8x64xf32>
    %123 = math.tanh %122 : vector<8x64xf32>
    %124 = vector.extract_strided_slice %121 {offsets = [0, 64], sizes = [8, 64], strides = [1, 1]} : vector<8x192xf32> to vector<8x64xf32>
    %125 = arith.mulf %124, %112 : vector<8x64xf32>
    %126 = vector.extract_strided_slice %121 {offsets = [0, 0], sizes = [8, 64], strides = [1, 1]} : vector<8x192xf32> to vector<8x64xf32>
    %127 = arith.mulf %126, %123 : vector<8x64xf32>
    %128 = arith.addf %125, %127 : vector<8x64xf32>
    %129 = vector.extract_strided_slice %121 {offsets = [0, 128], sizes = [8, 64], strides = [1, 1]} : vector<8x192xf32> to vector<8x64xf32>
    %130 = math.tanh %128 : vector<8x64xf32>
    %131 = arith.mulf %129, %130 : vector<8x64xf32>
    %132 = vector.extract_strided_slice %18 {offsets = [4, 0, 0], sizes = [1, 8, 64], strides = [1, 1, 1]} : vector<8x8x64xi1> to vector<1x8x64xi1>
    %133 = vector.shape_cast %132 : vector<1x8x64xi1> to vector<8x64xi1>
    %134 = arith.select %133, %131, %111 : vector<8x64xi1>, vector<8x64xf32>
    %135 = arith.select %133, %128, %112 : vector<8x64xi1>, vector<8x64xf32>
    %136 = vector.extract_strided_slice %6 {offsets = [40, 0], sizes = [8, 256], strides = [1, 1]} : vector<64x256xf32> to vector<8x256xf32>
    %cst_21 = arith.constant dense<0.000000e+00> : vector<8x256xf32>
    %137 = tpu.matmul %134, %7, %cst_21 {dimension_numbers = #tpu.dot_dimension_numbers<[1], [0], [0], [1], [0, 0, 1, 1], [], []>} : vector<8x64xf32>, vector<64x256xf32>, vector<8x256xf32> -> vector<8x256xf32>
    %138 = arith.addf %136, %137 : vector<8x256xf32>
    %139 = vector.extract_strided_slice %138 {offsets = [0, 0], sizes = [8, 192], strides = [1, 1]} : vector<8x256xf32> to vector<8x192xf32>
    %140 = arith.negf %139 : vector<8x192xf32>
    %141 = math.exp %140 : vector<8x192xf32>
    %cst_22 = arith.constant 1.000000e+00 : f32
    %142 = vector.broadcast %cst_22 : f32 to vector<8x192xf32>
    %143 = arith.addf %142, %141 : vector<8x192xf32>
    %144 = arith.divf %142, %143 : vector<8x192xf32>
    %145 = vector.extract_strided_slice %138 {offsets = [0, 192], sizes = [8, 64], strides = [1, 1]} : vector<8x256xf32> to vector<8x64xf32>
    %146 = math.tanh %145 : vector<8x64xf32>
    %147 = vector.extract_strided_slice %144 {offsets = [0, 64], sizes = [8, 64], strides = [1, 1]} : vector<8x192xf32> to vector<8x64xf32>
    %148 = arith.mulf %147, %135 : vector<8x64xf32>
    %149 = vector.extract_strided_slice %144 {offsets = [0, 0], sizes = [8, 64], strides = [1, 1]} : vector<8x192xf32> to vector<8x64xf32>
    %150 = arith.mulf %149, %146 : vector<8x64xf32>
    %151 = arith.addf %148, %150 : vector<8x64xf32>
    %152 = vector.extract_strided_slice %144 {offsets = [0, 128], sizes = [8, 64], strides = [1, 1]} : vector<8x192xf32> to vector<8x64xf32>
    %153 = math.tanh %151 : vector<8x64xf32>
    %154 = arith.mulf %152, %153 : vector<8x64xf32>
    %155 = vector.extract_strided_slice %18 {offsets = [5, 0, 0], sizes = [1, 8, 64], strides = [1, 1, 1]} : vector<8x8x64xi1> to vector<1x8x64xi1>
    %156 = vector.shape_cast %155 : vector<1x8x64xi1> to vector<8x64xi1>
    %157 = arith.select %156, %154, %134 : vector<8x64xi1>, vector<8x64xf32>
    %158 = arith.select %156, %151, %135 : vector<8x64xi1>, vector<8x64xf32>
    %159 = vector.extract_strided_slice %6 {offsets = [48, 0], sizes = [8, 256], strides = [1, 1]} : vector<64x256xf32> to vector<8x256xf32>
    %cst_23 = arith.constant dense<0.000000e+00> : vector<8x256xf32>
    %160 = tpu.matmul %157, %7, %cst_23 {dimension_numbers = #tpu.dot_dimension_numbers<[1], [0], [0], [1], [0, 0, 1, 1], [], []>} : vector<8x64xf32>, vector<64x256xf32>, vector<8x256xf32> -> vector<8x256xf32>
    %161 = arith.addf %159, %160 : vector<8x256xf32>
    %162 = vector.extract_strided_slice %161 {offsets = [0, 0], sizes = [8, 192], strides = [1, 1]} : vector<8x256xf32> to vector<8x192xf32>
    %163 = arith.negf %162 : vector<8x192xf32>
    %164 = math.exp %163 : vector<8x192xf32>
    %cst_24 = arith.constant 1.000000e+00 : f32
    %165 = vector.broadcast %cst_24 : f32 to vector<8x192xf32>
    %166 = arith.addf %165, %164 : vector<8x192xf32>
    %167 = arith.divf %165, %166 : vector<8x192xf32>
    %168 = vector.extract_strided_slice %161 {offsets = [0, 192], sizes = [8, 64], strides = [1, 1]} : vector<8x256xf32> to vector<8x64xf32>
    %169 = math.tanh %168 : vector<8x64xf32>
    %170 = vector.extract_strided_slice %167 {offsets = [0, 64], sizes = [8, 64], strides = [1, 1]} : vector<8x192xf32> to vector<8x64xf32>
    %171 = arith.mulf %170, %158 : vector<8x64xf32>
    %172 = vector.extract_strided_slice %167 {offsets = [0, 0], sizes = [8, 64], strides = [1, 1]} : vector<8x192xf32> to vector<8x64xf32>
    %173 = arith.mulf %172, %169 : vector<8x64xf32>
    %174 = arith.addf %171, %173 : vector<8x64xf32>
    %175 = vector.extract_strided_slice %167 {offsets = [0, 128], sizes = [8, 64], strides = [1, 1]} : vector<8x192xf32> to vector<8x64xf32>
    %176 = math.tanh %174 : vector<8x64xf32>
    %177 = arith.mulf %175, %176 : vector<8x64xf32>
    %178 = vector.extract_strided_slice %18 {offsets = [6, 0, 0], sizes = [1, 8, 64], strides = [1, 1, 1]} : vector<8x8x64xi1> to vector<1x8x64xi1>
    %179 = vector.shape_cast %178 : vector<1x8x64xi1> to vector<8x64xi1>
    %180 = arith.select %179, %177, %157 : vector<8x64xi1>, vector<8x64xf32>
    %181 = arith.select %179, %174, %158 : vector<8x64xi1>, vector<8x64xf32>
    %182 = vector.extract_strided_slice %6 {offsets = [56, 0], sizes = [8, 256], strides = [1, 1]} : vector<64x256xf32> to vector<8x256xf32>
    %cst_25 = arith.constant dense<0.000000e+00> : vector<8x256xf32>
    %183 = tpu.matmul %180, %7, %cst_25 {dimension_numbers = #tpu.dot_dimension_numbers<[1], [0], [0], [1], [0, 0, 1, 1], [], []>} : vector<8x64xf32>, vector<64x256xf32>, vector<8x256xf32> -> vector<8x256xf32>
    %184 = arith.addf %182, %183 : vector<8x256xf32>
    %185 = vector.extract_strided_slice %184 {offsets = [0, 0], sizes = [8, 192], strides = [1, 1]} : vector<8x256xf32> to vector<8x192xf32>
    %186 = arith.negf %185 : vector<8x192xf32>
    %187 = math.exp %186 : vector<8x192xf32>
    %cst_26 = arith.constant 1.000000e+00 : f32
    %188 = vector.broadcast %cst_26 : f32 to vector<8x192xf32>
    %189 = arith.addf %188, %187 : vector<8x192xf32>
    %190 = arith.divf %188, %189 : vector<8x192xf32>
    %191 = vector.extract_strided_slice %184 {offsets = [0, 192], sizes = [8, 64], strides = [1, 1]} : vector<8x256xf32> to vector<8x64xf32>
    %192 = math.tanh %191 : vector<8x64xf32>
    %193 = vector.extract_strided_slice %190 {offsets = [0, 64], sizes = [8, 64], strides = [1, 1]} : vector<8x192xf32> to vector<8x64xf32>
    %194 = arith.mulf %193, %181 : vector<8x64xf32>
    %195 = vector.extract_strided_slice %190 {offsets = [0, 0], sizes = [8, 64], strides = [1, 1]} : vector<8x192xf32> to vector<8x64xf32>
    %196 = arith.mulf %195, %192 : vector<8x64xf32>
    %197 = arith.addf %194, %196 : vector<8x64xf32>
    %198 = vector.extract_strided_slice %190 {offsets = [0, 128], sizes = [8, 64], strides = [1, 1]} : vector<8x192xf32> to vector<8x64xf32>
    %199 = math.tanh %197 : vector<8x64xf32>
    %200 = arith.mulf %198, %199 : vector<8x64xf32>
    %201 = vector.extract_strided_slice %18 {offsets = [7, 0, 0], sizes = [1, 8, 64], strides = [1, 1, 1]} : vector<8x8x64xi1> to vector<1x8x64xi1>
    %202 = vector.shape_cast %201 : vector<1x8x64xi1> to vector<8x64xi1>
    %203 = arith.select %202, %200, %180 : vector<8x64xi1>, vector<8x64xf32>
    %204 = vector.extract_strided_slice %203 {offsets = [0, 0], sizes = [8, 32], strides = [1, 1]} : vector<8x64xf32> to vector<8x32xf32>
    %205 = vector.extract_strided_slice %203 {offsets = [0, 32], sizes = [8, 32], strides = [1, 1]} : vector<8x64xf32> to vector<8x32xf32>
    %206 = arith.addf %204, %205 : vector<8x32xf32>
    %cst_27 = arith.constant 5.000000e-01 : f32
    %207 = vector.broadcast %cst_27 : f32 to vector<8x32xf32>
    %208 = arith.mulf %207, %206 : vector<8x32xf32>
    %c0_28 = arith.constant 0 : index
    %c0_29 = arith.constant 0 : index
    %209 = vector.load %arg10[%c0_28, %c0_29] : memref<1x128xf32, #tpu.memory_space<vmem>>, vector<1x32xf32>
    %c0_30 = arith.constant 0 : index
    %c32 = arith.constant 32 : index
    %210 = vector.load %arg10[%c0_30, %c32] : memref<1x128xf32, #tpu.memory_space<vmem>>, vector<1x32xf32>
    %c0_31 = arith.constant 0 : index
    %c64 = arith.constant 64 : index
    %211 = vector.load %arg10[%c0_31, %c64] : memref<1x128xf32, #tpu.memory_space<vmem>>, vector<1x32xf32>
    %c0_32 = arith.constant 0 : index
    %c96 = arith.constant 96 : index
    %212 = vector.load %arg10[%c0_32, %c96] : memref<1x128xf32, #tpu.memory_space<vmem>>, vector<1x32xf32>
    %c0_33 = arith.constant 0 : index
    %c0_34 = arith.constant 0 : index
    %c0_35 = arith.constant 0 : index
    %213 = vector.load %arg2[%c0_33, %c0_34, %c0_35] : memref<4x8x32xf32, #tpu.memory_space<vmem>>, vector<4x8x32xf32>
    %cst_36 = arith.constant dense<0.000000e+00> : vector<8x32xf32>
    %214 = vector.multi_reduction <add>, %213, %cst_36 [0] : vector<4x8x32xf32> to vector<8x32xf32>
    %cst_37 = arith.constant 4.000000e+00 : f32
    %215 = vector.broadcast %cst_37 : f32 to vector<8x32xf32>
    %216 = arith.divf %214, %215 : vector<8x32xf32>
    %c0_38 = arith.constant 0 : index
    %c0_39 = arith.constant 0 : index
    %c0_40 = arith.constant 0 : index
    %217 = vector.load %arg3[%c0_38, %c0_39, %c0_40] : memref<4x24x32xf32, #tpu.memory_space<vmem>>, vector<4x24x32xf32>
    %cst_41 = arith.constant dense<0.000000e+00> : vector<24x32xf32>
    %218 = vector.multi_reduction <add>, %217, %cst_41 [0] : vector<4x24x32xf32> to vector<24x32xf32>
    %cst_42 = arith.constant 4.000000e+00 : f32
    %219 = vector.broadcast %cst_42 : f32 to vector<24x32xf32>
    %220 = arith.divf %218, %219 : vector<24x32xf32>
    %221 = tpu.concatenate %216, %220 in 0 : vector<8x32xf32>, vector<24x32xf32> -> vector<32x32xf32>
    %c0_43 = arith.constant 0 : index
    %c0_44 = arith.constant 0 : index
    %222 = vector.load %arg8[%c0_43, %c0_44] : memref<32x64xf32, #tpu.memory_space<vmem>>, vector<32x64xf32>
    %cst_45 = arith.constant dense<0.000000e+00> : vector<32x64xf32>
    %223 = tpu.matmul %221, %222, %cst_45 {dimension_numbers = #tpu.dot_dimension_numbers<[1], [0], [0], [1], [0, 0, 1, 1], [], []>} : vector<32x32xf32>, vector<32x64xf32>, vector<32x64xf32> -> vector<32x64xf32>
    %c0_46 = arith.constant 0 : index
    %c0_47 = arith.constant 0 : index
    %224 = vector.load %arg7[%c0_46, %c0_47] : memref<32x32xf32, #tpu.memory_space<vmem>>, vector<32x32xf32>
    %cst_48 = arith.constant dense<0.000000e+00> : vector<8x32xf32>
    %225 = tpu.matmul %208, %224, %cst_48 {dimension_numbers = #tpu.dot_dimension_numbers<[1], [0], [0], [1], [0, 0, 1, 1], [], []>} : vector<8x32xf32>, vector<32x32xf32>, vector<8x32xf32> -> vector<8x32xf32>
    %226 = vector.extract_strided_slice %223 {offsets = [0, 0], sizes = [8, 32], strides = [1, 1]} : vector<32x64xf32> to vector<8x32xf32>
    %227 = arith.addf %225, %226 : vector<8x32xf32>
    %228 = vector.broadcast %209 : vector<1x32xf32> to vector<8x32xf32>
    %229 = arith.addf %227, %228 : vector<8x32xf32>
    %cst_49 = arith.constant 0.000000e+00 : f32
    %230 = vector.broadcast %cst_49 : f32 to vector<8x32xf32>
    %231 = arith.maximumf %229, %230 : vector<8x32xf32>
    %232 = vector.extract_strided_slice %223 {offsets = [8, 32], sizes = [24, 32], strides = [1, 1]} : vector<32x64xf32> to vector<24x32xf32>
    %233 = vector.broadcast %211 : vector<1x32xf32> to vector<24x32xf32>
    %234 = arith.addf %232, %233 : vector<24x32xf32>
    %cst_50 = arith.constant 0.000000e+00 : f32
    %235 = vector.broadcast %cst_50 : f32 to vector<24x32xf32>
    %236 = arith.maximumf %234, %235 : vector<24x32xf32>
    %237 = tpu.concatenate %231, %236 in 0 : vector<8x32xf32>, vector<24x32xf32> -> vector<32x32xf32>
    %c0_51 = arith.constant 0 : index
    %c0_52 = arith.constant 0 : index
    %238 = vector.load %arg9[%c0_51, %c0_52] : memref<32x64xf32, #tpu.memory_space<vmem>>, vector<32x64xf32>
    %cst_53 = arith.constant dense<0.000000e+00> : vector<32x64xf32>
    %239 = tpu.matmul %237, %238, %cst_53 {dimension_numbers = #tpu.dot_dimension_numbers<[1], [0], [0], [1], [0, 0, 1, 1], [], []>} : vector<32x32xf32>, vector<32x64xf32>, vector<32x64xf32> -> vector<32x64xf32>
    %240 = vector.extract_strided_slice %239 {offsets = [0, 0], sizes = [8, 32], strides = [1, 1]} : vector<32x64xf32> to vector<8x32xf32>
    %241 = vector.broadcast %210 : vector<1x32xf32> to vector<8x32xf32>
    %242 = arith.addf %240, %241 : vector<8x32xf32>
    %243 = vector.extract_strided_slice %239 {offsets = [8, 32], sizes = [24, 32], strides = [1, 1]} : vector<32x64xf32> to vector<24x32xf32>
    %244 = vector.broadcast %212 : vector<1x32xf32> to vector<24x32xf32>
    %245 = arith.addf %243, %244 : vector<24x32xf32>
    %246 = vector.extract_strided_slice %245 {offsets = [0, 0], sizes = [8, 32], strides = [1, 1]} : vector<24x32xf32> to vector<8x32xf32>
    %247 = vector.extract_strided_slice %245 {offsets = [8, 0], sizes = [8, 32], strides = [1, 1]} : vector<24x32xf32> to vector<8x32xf32>
    %248 = vector.extract_strided_slice %245 {offsets = [16, 0], sizes = [8, 32], strides = [1, 1]} : vector<24x32xf32> to vector<8x32xf32>
    %249 = tpu.concatenate %242, %246, %247, %248 in 1 : vector<8x32xf32>, vector<8x32xf32>, vector<8x32xf32>, vector<8x32xf32> -> vector<8x128xf32>
    %c0_54 = arith.constant 0 : index
    %c0_55 = arith.constant 0 : index
    %250 = vector.load %arg11[%c0_54, %c0_55] : memref<8x128xf32, #tpu.memory_space<vmem>>, vector<8x128xf32>
    tpu.vector_store %arg11[%c0_54, %c0_55], %249 {strides = array<i32>} : memref<8x128xf32, #tpu.memory_space<vmem>>, vector<8x128xf32>,
    return
  }
}

</mosaic_0001>

<bundles_post_ra>
// kernel: tpu_custom_call.1
= control target key start
LH: loop header
LB: loop body
LE: loop exit
PB: predicated region body
PF: predicated region fallthrough
CT: control target
= control target key end

     0   :  { %16 = vsyncpa [#allocation3], 0  ;;  %s2433_s0 = inlined_call_operand.hbm [shape: f32[64,64], index: 0, kind: input, shape index: {}]   ;;  %s2434_s1 = inlined_call_operand.vmem [shape: s32[8,1], index: 1, kind: input, shape index: {}]   ;;  %s2435_s2 = inlined_call_operand.hbm [shape: f32[4,8,32], index: 2, kind: input, shape index: {}]   ;;  %s2436_s3 = inlined_call_operand.hbm [shape: f32[4,24,32], index: 3, kind: input, shape index: {}]   ;;  %s2437_s4 = inlined_call_operand.hbm [shape: f32[64,256], index: 4, kind: input, shape index: {}]   ;;  %s2438_s5 = inlined_call_operand.hbm [shape: f32[64,256], index: 5, kind: input, shape index: {}]   ;;  %s2439_s6 = inlined_call_operand.vmem [shape: f32[1,256], index: 6, kind: input, shape index: {}]   ;;  %s2440_s7 = inlined_call_operand.hbm [shape: f32[32,32], index: 7, kind: input, shape index: {}]   ;;  %s2441_s8 = inlined_call_operand.hbm [shape: f32[32,64], index: 8, kind: input, shape index: {}]   ;;  %s2442_s9 = inlined_call_operand.hbm [shape: f32[32,64], index: 9, kind: input, shape index: {}]   ;;  %s2443_s10 = inlined_call_operand.vmem [shape: f32[1,128], index: 10, kind: input, shape index: {}]   ;;  %s2444_s11 = inlined_call_operand.hbm [shape: f32[8,128], index: 11, kind: output, shape index: {}]  }
   0x1   :  { %17 = vsyncpa [#allocation6], 0 }
   0x2   :  { %18 = vsyncpa [#allocation9], 0 }
   0x3   :  { %19 = vsyncpa [#allocation12], 0 }
   0x4   :  { %20 = vsyncpa [#allocation15], 0 }
   0x5   :  { %21 = vsyncpa [#allocation4], 0  ;;  %s41_s19 = sshll.u32 %s2435_s2, 4  ;;  %s1870_s20 = smov [#allocation5]   ;;  %s42_s19 = int_to_ptr.hbm [resolvable:$true] %s41_s19 }
   0x6   :  { %s43_s21 = sshll.u32 %s1870_s20, 4  ;;  %s67_s24 = sshll.u32 %s2437_s4, 4  ;;  %s44_s21 = int_to_ptr.vmem [resolvable:$true] %s43_s21  ;;  %s68_s24 = int_to_ptr.hbm [resolvable:$true] %s67_s24 }
   0x7   :  { %s1871_s25 = smov 128   ;;  %s1872_s26 = smov 8  }
   0x8   :  { %49 = dma.hbm_to_vmem [thread:$0]  %s42_s19, 512, %s44_s21, [#allocation6], %s1871_s25, %s1871_s25, %s1872_s26  }
   0x9   :  { %s1873_s27 = smov [#allocation8]   ;;  %s1874_s29 = smov 256  }
   0xa   :  { %s69_s28 = sshll.u32 %s1873_s27, 4  ;;  %s1875_s2 = smov 16   ;;  %s70_s28 = int_to_ptr.vmem [resolvable:$true] %s69_s28 }
   0xb   :  { %75 = dma.hbm_to_vmem [thread:$0]  %s68_s24, 2048, %s70_s28, [#allocation9], %s1874_s29, %s1874_s29, %s1875_s2  }
   0xc   :  { %s95_s4 = sshll.u32 %s2440_s7, 4  ;;  %s1876_s13 = smov [#allocation11]   ;;  %s96_s4 = int_to_ptr.hbm [resolvable:$true] %s95_s4 }
   0xd   :  { %s97_s14 = sshll.u32 %s1876_s13, 4  ;;  %s26_s17 = sshll.u32 %s2433_s0, 4  ;;  %s98_s14 = int_to_ptr.vmem [resolvable:$true] %s97_s14  ;;  %s27_s17 = int_to_ptr.hbm [resolvable:$true] %s26_s17 }
   0xe   :  { %103 = dma.hbm_to_vmem [thread:$0]  %s96_s4, 512, %s98_s14, [#allocation12], %s1871_s25, %s1871_s25, %s1872_s26  }
   0xf   :  { %s1877_s18 = smov [#allocation2]   ;;  %s54_s22 = sshll.u32 %s2436_s3, 4  ;;  %s55_s22 = int_to_ptr.hbm [resolvable:$true] %s54_s22 }
  0x10   :  { %s28_s19 = sshll.u32 %s1877_s18, 4  ;;  %s80_s0 = sshll.u32 %s2438_s5, 4  ;;  %s29_s19 = int_to_ptr.vmem [resolvable:$true] %s28_s19  ;;  %s81_s0 = int_to_ptr.hbm [resolvable:$true] %s80_s0 }
  0x11   :  { %34 = dma.hbm_to_vmem [thread:$0]  %s27_s17, 1024, %s29_s19, [#allocation3], %s1871_s25, %s1871_s25, %s1872_s26  }
  0x12   :  { %s1878_s24 = smov [#allocation7]   ;;  %s1879_s28 = smov [#allocation10]  }
  0x13   :  { %s56_s27 = sshll.u32 %s1878_s24, 4  ;;  %s82_s3 = sshll.u32 %s1879_s28, 4  ;;  %s57_s27 = int_to_ptr.vmem [resolvable:$true] %s56_s27  ;;  %s83_s3 = int_to_ptr.vmem [resolvable:$true] %s82_s3 }
  0x14   :  { %62 = dma.hbm_to_vmem [thread:$0]  %s55_s22, 1536, %s57_s27, [#allocation6], %s1871_s25, %s1871_s25, %s1872_s26  }
  0x15   :  { %s108_s4 = sshll.u32 %s2441_s8, 4  ;;  %s121_s14 = sshll.u32 %s2442_s9, 4  ;;  %s109_s4 = int_to_ptr.hbm [resolvable:$true] %s108_s4  ;;  %s122_s14 = int_to_ptr.hbm [resolvable:$true] %s121_s14 }
  0x16   :  { %88 = dma.hbm_to_vmem [thread:$0]  %s81_s0, 2048, %s83_s3, [#allocation9], %s1874_s29, %s1874_s29, %s1875_s2  }
  0x17   :  { %s1880_s15 = smov [#allocation13]   ;;  %s1881_s17 = smov [#allocation14]  }
  0x18   :  { %s110_s16 = sshll.u32 %s1880_s15, 4  ;;  %s123_s8 = sshll.u32 %s1881_s17, 4  ;;  %s111_s16 = int_to_ptr.vmem [resolvable:$true] %s110_s16  ;;  %s124_s8 = int_to_ptr.vmem [resolvable:$true] %s123_s8 }
  0x19   :  { %116 = dma.hbm_to_vmem [thread:$0]  %s109_s4, 512, %s111_s16, [#allocation12], %s1871_s25, %s1871_s25, %s1872_s26  }
  0x1a   :  { %129 = dma.hbm_to_vmem [thread:$0]  %s122_s14, 512, %s124_s8, [#allocation15], %s1871_s25, %s1871_s25, %s1872_s26  }
  0x1b   :  { %1858 = dma.done.wait [#allocation3], 1024  }
  0x1c   :  { %1859 = vsyncadd [#allocation3], 4294966272 }
  0x1d   :  { %1860 = dma.done.wait [#allocation6], 2048  }
  0x1e   :  { %1861 = vsyncadd [#allocation6], 4294965248 }
  0x1f   :  { %1862 = dma.done.wait [#allocation9], 4096  }
  0x20   :  { %1863 = vsyncadd [#allocation9], 4294963200 }
  0x21   :  { %1864 = dma.done.wait [#allocation12], 1024  }
  0x22   :  { %1865 = vsyncadd [#allocation12], 4294966272 }
  0x23   :  { %1866 = dma.done.wait [#allocation15], 512  }
  0x24   :  { %1867 = vsyncadd [#allocation15], 4294966784  ;;  %v2004_v0 = vld [vmem:[#allocation10 + $0x78] sm:$0xff]  ;;  %v2006_v1 = vld [vmem:[#allocation10 + $0x68] sm:$0xff]  ;;  %vm195_vm0 = vcmask 523264   ;;  %v1882_v20 = vmov 0.0  }
  0x25   :  { %v188_v2 = vld [vmem:[#allocation8 + $0x78] sm:$0xff]  ;;  %371 = vmatpush.msra.mxu3 %v2004_v0  ;;  %v186_v3 = vld [vmem:[#allocation8 + $0x68] sm:$0xff]  ;;  %v2018_v10 = vld [vmem:[#allocation10 + $0x70] sm:$0xff]  ;;  %s1883_s26 = smov 64   ;;  %s1893_s18 = smov 96  }
  0x26   :  { %269 = vmatpush.msra.mxu1 %v188_v2  ;;  %v2009_v4 = vld [vmem:[#allocation10 + $0x58] sm:$0xff]  ;;  %v2012_v6 = vld [vmem:[#allocation10 + $0x48] sm:$0xff]  ;;  %458 = vmatpush.msra.mxu2 %v2018_v10  ;;  %v2024_v13 = vld [vmem:[#allocation10 + $0x60] sm:$0xff]  ;;  %s1895_s19 = smov [#allocation16]   ;;  %s1446_s7 = sshll.u32 %s2444_s11, 4  ;;  %s1447_s7 = int_to_ptr.hbm [resolvable:$true] %s1446_s7 }
  0x27   :  { %v184_v5 = vld [vmem:[#allocation8 + $0x58] sm:$0xff]  ;;  %372 = vmatpush.msra.mxu3 %v2006_v1  ;;  %v182_v7 = vld [vmem:[#allocation8 + $0x48] sm:$0xff]  ;;  %v2030_v16 = vld [vmem:[#allocation10 + $0x50] sm:$0xff]  ;;  %s1444_s20 = sshll.u32 %s1895_s19, 4  ;;  %s1445_s20 = int_to_ptr.vmem [resolvable:$true] %s1444_s20 }
  0x28   :  { %270 = vmatpush.msra.mxu1 %v186_v3  ;;  %v2015_v8 = vld [vmem:[#allocation10 + $0x38] sm:$0xff]  ;;  %v2020_v11 = vld [vmem:[#allocation10 + $0x28] sm:$0xff]  ;;  %459 = vmatpush.msra.mxu2 %v2024_v13  ;;  %v2036_v19 = vld [vmem:[#allocation2] sm:$0xff] }
  0x29   :  { %373 = vmatpush.msra.mxu3 %v2009_v4  ;;  %v180_v9 = vld [vmem:[#allocation8 + $0x38] sm:$0xff]  ;;  %v178_v12 = vld [vmem:[#allocation8 + $0x28] sm:$0xff]  ;;  %v2043_v21 = vld [vmem:[#allocation10 + $0x40] sm:$0xff] }
  0x2a   :  { %271 = vmatpush.msra.mxu1 %v184_v5  ;;  %v2026_v14 = vld [vmem:[#allocation10 + $0x18] sm:$0xff]  ;;  %v2032_v17 = vld [vmem:[#allocation10 + $0x8] sm:$0xff]  ;;  %460 = vmatpush.msra.mxu2 %v2030_v16  ;;  %v2057_v23 = vld [vmem:[#allocation10 + $0x30] sm:$0xff] }
  0x2b   :  { %374 = vmatpush.msra.mxu3 %v2012_v6  ;;  %v176_v15 = vld [vmem:[#allocation8 + $0x18] sm:$0xff]  ;;  %v174_v18 = vld [vmem:[#allocation8 + $0x8] sm:$0xff]  ;;  %v187_v24 = vld [vmem:[#allocation8 + $0x70] sm:$0xff] }
  0x2c   :  { %272 = vmatpush.msra.mxu1 %v182_v7  ;;  %461 = vmatpush.msra.mxu2 %v2043_v21  ;;  %v2049_v22 = vld [vmem:[#allocation2 + $0x8] sm:$0xff]  ;;  %v2063_v25 = vld [vmem:[#allocation2 + $0x10] sm:$0xff]  ;;  %v185_v26 = vld [vmem:[#allocation8 + $0x60] sm:$0xff] }
  0x2d   :  { %375 = vmatpush.msra.mxu3 %v2015_v8  ;;  %228 = vmatpush.msra.mxu0 %v187_v24  ;;  %v183_v27 = vld [vmem:[#allocation8 + $0x50] sm:$0xff]  ;;  %v2069_v28 = vld [vmem:[#allocation10 + $0x20] sm:$0xff]  ;;  %v168_v31 = vld [vmem:[#allocation2 + $0x18] sm:$0xff] }
  0x2e   :  { %273 = vmatpush.msra.mxu1 %v180_v9  ;;  %462 = vmatpush.msra.mxu2 %v2057_v23  ;;  %v181_v29 = vld [vmem:[#allocation8 + $0x40] sm:$0xff]  ;;  %v179_v30 = vld [vmem:[#allocation8 + $0x30] sm:$0xff]  ;;  %v170_v38 = vld [vmem:[#allocation2 + $0x28] sm:$0xff] }
  0x2f   :  { %376 = vmatpush.msra.mxu3 %v2020_v11  ;;  %229 = vmatpush.msra.mxu0 %v185_v26  ;;  %v177_v32 = vld [vmem:[#allocation8 + $0x20] sm:$0xff]  ;;  %v175_v33 = vld [vmem:[#allocation8 + $0x10] sm:$0xff]  ;;  %v172_v40 = vld [vmem:[#allocation2 + $0x38] sm:$0xff] }
  0x30   :  { %274 = vmatpush.msra.mxu1 %v178_v12  ;;  %463 = vmatpush.msra.mxu2 %v2069_v28  ;;  %v2078_v34 = vld [vmem:[#allocation10 + $0x10] sm:$0xff]  ;;  %v2080_v35 = vld [vmem:[#allocation10] sm:$0xff] }
  0x31   :  { %377 = vmatpush.msra.mxu3 %v2026_v14  ;;  %230 = vmatpush.msra.mxu0 %v183_v27  ;;  %v173_v36 = vld [vmem:[#allocation8] sm:$0xff]  ;;  %v171_v39 = vld [vmem:[#allocation2 + $0x30] sm:$0xff] }
  0x32   :  { %275 = vmatpush.msra.mxu1 %v176_v15  ;;  %464 = vmatpush.msra.mxu2 %v2078_v34  ;;  %v169_v37 = vld [vmem:[#allocation2 + $0x20] sm:$0xff] }
  0x33   :  { %378 = vmatpush.msra.mxu3 %v2032_v17  ;;  %231 = vmatpush.msra.mxu0 %v181_v29  ;;  %v189_v41 = vld [vmem:[%s2439_s6] sm:$0x3] }
  0x34   :  { %276 = vmatpush.msra.mxu1 %v174_v18  ;;  %379 = vmatmul.f32.vlgmr.msra.gmra.mxu3 %v1882_v20  ;;  %v192_v42 = vperm.slane %v189_v41, 1  ;;  %v2156_v62 = vperm.slane %v189_v41, 0 }
  0x35   :  { %1468 = vmatmul.msk.f32.vlgmr.msra.gmra.mxu1 %vm195_vm0, %v2036_v19  ;;  %478 = vmatpush.msrb.mxu3 %v2004_v0 }
  0x36   :  { %351 = vmatpush.msrb.mxu1 %v2018_v10  ;;  %232 = vmatpush.msra.mxu0 %v179_v30 }
  0x37   :  { %479 = vmatpush.msrb.mxu3 %v2006_v1  ;;  %465 = vmatpush.msra.mxu2 %v2080_v35 }
  0x38   :  { %352 = vmatpush.msrb.mxu1 %v2024_v13  ;;  %233 = vmatpush.msra.mxu0 %v177_v32  ;;  %v1884_v32 = vmov 0  }
  0x39   :  { %480 = vmatpush.msrb.mxu3 %v2009_v4  ;;  %569 = vmatpush.msrb.mxu2 %v2018_v10 }
  0x3a   :  { %353 = vmatpush.msrb.mxu1 %v2030_v16  ;;  %234 = vmatpush.msra.mxu0 %v175_v33 }
  0x3b   :  { %481 = vmatpush.msrb.mxu3 %v2012_v6  ;;  %570 = vmatpush.msrb.mxu2 %v2024_v13 }
  0x3c   :  { %354 = vmatpush.msrb.mxu1 %v2043_v21  ;;  %235 = vmatpush.msra.mxu0 %v173_v36 }
  0x3d   :  { %1469 = vmatmul.msk.f32.gmra.mxu1 %vm195_vm0, %v2049_v22  ;;  %482 = vmatpush.msrb.mxu3 %v2015_v8 }
  0x3e   :  { %355 = vmatpush.msrb.mxu1 %v2057_v23  ;;  %1460 = vmatmul.msk.f32.vlgmr.msra.gmra.mxu0 %vm195_vm0, %v2036_v19 }
  0x3f   :  { %483 = vmatpush.msrb.mxu3 %v2020_v11  ;;  %571 = vmatpush.msrb.mxu2 %v2030_v16 }
  0x40   :  { %356 = vmatpush.msrb.mxu1 %v2069_v28  ;;  %1013 = vmatpush.msrb.mxu0 %v2018_v10 }
  0x41   :  { %484 = vmatpush.msrb.mxu3 %v2026_v14  ;;  %572 = vmatpush.msrb.mxu2 %v2043_v21 }
  0x42   :  { %357 = vmatpush.msrb.mxu1 %v2078_v34  ;;  %1014 = vmatpush.msrb.mxu0 %v2024_v13 }
  0x43   :  { %485 = vmatpush.msrb.mxu3 %v2032_v17  ;;  %573 = vmatpush.msrb.mxu2 %v2057_v23 }
  0x44   :  { %358 = vmatpush.msrb.mxu1 %v2080_v35  ;;  %1015 = vmatpush.msrb.mxu0 %v2030_v16 }
  0x45   :  { %1470 = vmatmul.msk.f32.gmra.mxu1 %vm195_vm0, %v2063_v25  ;;  %589 = vmatpush.msra.mxu3 %v2004_v0 }
  0x46   :  { %811 = vmatpush.msra.mxu1 %v2004_v0  ;;  %1461 = vmatmul.msk.f32.gmra.mxu0 %vm195_vm0, %v2049_v22 }
  0x47   :  { %590 = vmatpush.msra.mxu3 %v2006_v1  ;;  %574 = vmatpush.msrb.mxu2 %v2069_v28 }
  0x48   :  { %812 = vmatpush.msra.mxu1 %v2006_v1  ;;  %1016 = vmatpush.msrb.mxu0 %v2043_v21 }
  0x49   :  { %591 = vmatpush.msra.mxu3 %v2009_v4  ;;  %575 = vmatpush.msrb.mxu2 %v2078_v34 }
  0x4a   :  { %813 = vmatpush.msra.mxu1 %v2009_v4  ;;  %1017 = vmatpush.msrb.mxu0 %v2057_v23 }
  0x4b   :  { %592 = vmatpush.msra.mxu3 %v2012_v6  ;;  %576 = vmatpush.msrb.mxu2 %v2080_v35 }
  0x4c   :  { %814 = vmatpush.msra.mxu1 %v2012_v6  ;;  %1018 = vmatpush.msrb.mxu0 %v2069_v28 }
  0x4d   :  { %1471 = vmatmul.msk.f32.gmra.mxu1 %vm195_vm0, %v168_v31  ;;  %593 = vmatpush.msra.mxu3 %v2015_v8 }
  0x4e   :  { %815 = vmatpush.msra.mxu1 %v2015_v8  ;;  %1462 = vmatmul.msk.f32.gmra.mxu0 %vm195_vm0, %v2063_v25 }
  0x4f   :  { %594 = vmatpush.msra.mxu3 %v2020_v11  ;;  %1019 = vmatpush.msrb.mxu0 %v2078_v34 }
  0x50   :  { %816 = vmatpush.msra.mxu1 %v2020_v11  ;;  %1541 = vset.pattern.permute.xlu1 %v1884_v32 }
  0x51   :  { %595 = vmatpush.msra.mxu3 %v2026_v14  ;;  %1020 = vmatpush.msrb.mxu0 %v2080_v35 }
  0x52   :  { %817 = vmatpush.msra.mxu1 %v2026_v14  ;;  %1542 = vset.pattern.permute.xlu0 %v1884_v32 }
  0x53   :  { %596 = vmatpush.msra.mxu3 %v2032_v17 }
  0x54   :  { %818 = vmatpush.msra.mxu1 %v2032_v17 }
  0x55   :  { %1472 = vmatmul.msk.f32.gmra.mxu1 %vm195_vm0, %v169_v37 }
  0x56   :  { %1463 = vmatmul.msk.f32.gmra.mxu0 %vm195_vm0, %v168_v31 }
  0x5d   :  { %1473 = vmatmul.msk.f32.gmra.mxu1 %vm195_vm0, %v170_v38 }
  0x5e   :  { %1464 = vmatmul.msk.f32.gmra.mxu0 %vm195_vm0, %v169_v37 }
  0x65   :  { %1474 = vmatmul.msk.f32.gmra.mxu1 %vm195_vm0, %v171_v39 }
  0x66   :  { %1465 = vmatmul.msk.f32.gmra.mxu0 %vm195_vm0, %v170_v38 }
  0x6d   :  { %1475 = vmatmul.msk.f32.gmra.mxu1 %vm195_vm0, %v172_v40 }
  0x6e   :  { %1466 = vmatmul.msk.f32.gmra.mxu0 %vm195_vm0, %v171_v39  ;;  %v164_v39 = vld [vmem:[%s2434_s1] sm:$0xff] }
  0x75   :  { %359 = vmatmul.f32.vlgmr.msrb.gmra.mxu1 %v1882_v20 }
  0x76   :  { %1033 = vmatpush.msrb.mxu1 %v2004_v0  ;;  %1467 = vmatmul.msk.f32.gmra.mxu0 %vm195_vm0, %v172_v40 }
  0x78   :  { %1034 = vmatpush.msrb.mxu1 %v2006_v1 }
  0x7a   :  { %1035 = vmatpush.msrb.mxu1 %v2009_v4 }
  0x7c   :  { %1036 = vmatpush.msrb.mxu1 %v2012_v6 }
  0x7e   :  { %1037 = vmatpush.msrb.mxu1 %v2015_v8 }
  0x80   :  { %1038 = vmatpush.msrb.mxu1 %v2020_v11 }
  0x82   :  { %1039 = vmatpush.msrb.mxu1 %v2026_v14 }
  0x84   :  { %1040 = vmatpush.msrb.mxu1 %v2032_v17 }
  0xb2   :  { %v278_v43 = vpop.f32.mrf.mxu1 }
  0xb3   :  { %v279_v44 = vadd.f32 %v278_v43, %v192_v42 }
  0xb7   :  { %v380_v45 = vpop.f32.mrf.mxu3 }
  0xb8   :  { %v384_v46 = vadd.f32 %v380_v45, %v279_v44 }
  0xba   :  { %v281_v47 = vpop.f32.mrf.mxu1  ;;  %1544 = vtanh.f32 %v384_v46  ;;  %v1477_v40 = vmul.f32 -1.442695, %v384_v46 }
  0xbb   :  { %v2141_v48 = vadd.f32 %v281_v47, %v192_v42  ;;  %v237_v63 = vpop.f32.mrf.mxu0  ;;  %v318_v47 = vlaneseq }
  0xbc   :  { %v238_v2 = vadd.f32 %v237_v63, %v2156_v62  ;;  %v1885_v63 = vmov 7  }
  0xc0   :  { %v1545_v49 = vpop.eup %1544 }
  0xc1   :  { %426 = vrot.lane.b32.xlu0 %v1545_v49, %s1883_s26 }
  0xc2   :  { %v284_v50 = vpop.f32.mrf.mxu1 }
  0xc3   :  { %v2144_v51 = vadd.f32 %v284_v50, %v192_v42  ;;  %v2167_v50 = vand.u32 127, %v318_v47 }
  0xc5   :  { %vm320_vm7 = vcmp.lt.s32.totalorder %v2167_v50, 32 }
  0xca   :  { %v287_v52 = vpop.f32.mrf.mxu1 }
  0xcb   :  { %v2146_v53 = vadd.f32 %v287_v52, %v192_v42 }
  0xd2   :  { %v290_v54 = vpop.f32.mrf.mxu1 }
  0xd3   :  { %v2148_v55 = vadd.f32 %v290_v54, %v192_v42 }
  0xda   :  { %v293_v56 = vpop.f32.mrf.mxu1 }
  0xdb   :  { %v2150_v57 = vadd.f32 %v293_v56, %v192_v42 }
  0xe2   :  { %v296_v58 = vpop.f32.mrf.mxu1 }
  0xe3   :  { %v2152_v59 = vadd.f32 %v296_v58, %v192_v42 }
  0xea   :  { %v299_v60 = vpop.f32.mrf.mxu1 }
  0xeb   :  { %v2154_v61 = vadd.f32 %v299_v60, %v192_v42 }
  0xf2   :  { %v360_v3 = vpop.f32.mrf.mxu1 }
  0xf3   :  { %v383_v5 = vadd.f32 %v360_v3, %v238_v2  ;;  %v321_v2 = vsel %vm320_vm7, 0, %v1885_v63 }
  0xf5   :  { %v1476_v7 = vmul.f32 -1.442695, %v383_v5 }
  0xf7   :  { %1546 = vpow2.f32 %v1476_v7 }
  0xfd   :  { %v1547_v9 = vpop.eup %1546 }
  0xfe   :  { %v391_v12 = vadd.f32 1.0, %v1547_v9 }
 0x100   :  { %1548 = vrcp.f32 %v391_v12  ;;  %vm398_vm1 = vweird.f32 %v391_v12  ;;  %v404_v22 = vand.u32 2147483648, %v391_v12  ;;  %v402_v25 = vand.u32 2147483647, %v391_v12 }
 0x102   :  { %v405_v26 = vor.u32 1.1754944e-38, %v404_v22  ;;  %vm403_vm4 = vcmp.eq.f32.partialorder %v402_v25, 8.507059e+37  ;;  %v240_v22 = vpop.f32.mrf.mxu0 }
 0x106   :  { %v1549_v15 = vpop.eup %1548 }
 0x107   :  { %v394_v18 = vmul.f32 %v1549_v15, %v391_v12  ;;  %vm399_vm2 = vweird.f32 %v1549_v15 }
 0x108   :  { %vm400_vm3 = vmor %vm398_vm1, %vm399_vm2 }
 0x109   :  { %v395_v19 = vsub.f32 1.0, %v394_v18 }
 0x10b   :  { %v396_v20 = vmul.f32 %v1549_v15, %v395_v19 }
 0x10d   :  { %v397_v24 = vadd.f32 %v1549_v15, %v396_v20 }
 0x10f   :  { %v401_v27 = vsel %vm400_vm3, %v1549_v15, %v397_v24  ;;  %v241_v24 = vadd.f32 %v240_v22, %v2156_v62 }
 0x110   :  { %v406_v30 = vsel %vm403_vm4, %v405_v26, %v401_v27 }
 0x111   :  { %v424_v33 = vmul.f32 0.0, %v406_v30 }
 0x133   :  { %v427_v29 = vpop.permute.xlu0 %426 }
 0x134   :  { %v429_v31 = vmul.f32 %v427_v29, %v406_v30 }
 0x136   :  { %431 = vrot.lane.b32.xlu0 %v429_v31, %s1883_s26 }
 0x1a8   :  { %v432_v36 = vpop.permute.xlu0 %431 }
 0x1a9   :  { %v434_v37 = vadd.f32 %v432_v36, %v424_v33 }
 0x1ab   :  { %1550 = vtanh.f32 %v434_v37  ;;  %443 = vrot.lane.b32.xlu2 %v434_v37, %s1883_s26 }
 0x1ac   :  { %1552 = vpow2.f32 %v1477_v40 }
 0x1b1   :  { %v1551_v38 = vpop.eup %1550 }
 0x1b2   :  { %437 = vrot.lane.b32.xlu1 %v1551_v38, %s1883_s26  ;;  %v1553_v41 = vpop.eup %1552 }
 0x1b3   :  { %v392_v42 = vadd.f32 1.0, %v1553_v41 }
 0x1b5   :  { %1554 = vrcp.f32 %v392_v42  ;;  %v419_v56 = vand.u32 2147483648, %v392_v42  ;;  %vm413_vm6 = vweird.f32 %v392_v42  ;;  %v417_v58 = vand.u32 2147483647, %v392_v42 }
 0x1b7   :  { %v420_v60 = vor.u32 1.1754944e-38, %v419_v56  ;;  %vm418_vm9 = vcmp.eq.f32.partialorder %v417_v58, 8.507059e+37 }
 0x1ba   :  { %330 = vperm.xlu1 %1541, %v164_v39  }
 0x1bb   :  { %v1555_v43 = vpop.eup %1554 }
 0x1bc   :  { %v409_v44 = vmul.f32 %v1555_v43, %v392_v42  ;;  %vm414_vm5 = vweird.f32 %v1555_v43 }
 0x1bd   :  { %vm415_vm8 = vmor %vm413_vm6, %vm414_vm5 }
 0x1be   :  { %v410_v45 = vsub.f32 1.0, %v409_v44 }
 0x1c0   :  { %v411_v49 = vmul.f32 %v1555_v43, %v410_v45 }
 0x1c2   :  { %v412_v52 = vadd.f32 %v1555_v43, %v411_v49 }
 0x1c4   :  { %v416_v46 = vsel %vm415_vm8, %v1555_v43, %v412_v52 }
 0x1c5   :  { %v421_v3 = vsel %vm418_vm9, %v420_v60, %v416_v46 }
 0x205   :  { %v444_v9 = vpop.permute.xlu2 %443 }
 0x224   :  { %v438_v54 = vpop.permute.xlu1 %437 }
 0x225   :  { %v440_v5 = vmul.f32 %v438_v54, %v421_v3 }
 0x22c   :  { %v2172_v7 = vpop.permute.xlu1 %330 }
 0x22d   :  { %vm332_vm10 = vcmp.gt.s32.totalorder %v2172_v7, %v321_v2 }
 0x22e   :  { %v2175_v12 = vsel %vm332_vm10, %v444_v9, 0.0  ;;  %v2177_v15 = vsel %vm332_vm10, %v440_v5, 0.0 }
 0x22f   :  { %532 = vrot.lane.b32.xlu0 %v2175_v12, %s1883_s26  ;;  %1478 = vmatmul.msk.f32.vlgmr.msra.gmra.mxu2 %vm195_vm0, %v2177_v15 }
 0x230   :  { %1479 = vmatmul.msk.f32.vlgmr.msrb.gmra.mxu3 %vm195_vm0, %v2177_v15  ;;  %680 = vmatpush.msra.mxu2 %v2018_v10 }
 0x231   :  { %700 = vmatpush.msrb.mxu3 %v2004_v0 }
 0x232   :  { %681 = vmatpush.msra.mxu2 %v2024_v13 }
 0x233   :  { %701 = vmatpush.msrb.mxu3 %v2006_v1 }
 0x234   :  { %682 = vmatpush.msra.mxu2 %v2030_v16 }
 0x235   :  { %702 = vmatpush.msrb.mxu3 %v2009_v4 }
 0x236   :  { %683 = vmatpush.msra.mxu2 %v2043_v21 }
 0x237   :  { %703 = vmatpush.msrb.mxu3 %v2012_v6 }
 0x238   :  { %684 = vmatpush.msra.mxu2 %v2057_v23 }
 0x239   :  { %704 = vmatpush.msrb.mxu3 %v2015_v8 }
 0x23a   :  { %685 = vmatpush.msra.mxu2 %v2069_v28 }
 0x23b   :  { %705 = vmatpush.msrb.mxu3 %v2020_v11 }
 0x23c   :  { %686 = vmatpush.msra.mxu2 %v2078_v34 }
 0x23d   :  { %706 = vmatpush.msrb.mxu3 %v2026_v14 }
 0x23e   :  { %687 = vmatpush.msra.mxu2 %v2080_v35 }
 0x23f   :  { %707 = vmatpush.msrb.mxu3 %v2032_v17 }
 0x2a1   :  { %v533_v45 = vpop.permute.xlu0 %532 }
 0x2b2   :  { %v467_v25 = vpop.f32.mrf.mxu2 }
 0x2b3   :  { %v487_v18 = vpop.f32.mrf.mxu3  ;;  %v490_v26 = vadd.f32 %v467_v25, %v241_v24  ;;  %v1886_v24 = vmov 6  }
 0x2b4   :  { %v491_v19 = vadd.f32 %v487_v18, %v2141_v48 }
 0x2b5   :  { %v1480_v27 = vmul.f32 -1.442695, %v490_v26 }
 0x2b6   :  { %1556 = vtanh.f32 %v491_v19  ;;  %v1481_v56 = vmul.f32 -1.442695, %v491_v19  ;;  %v322_v19 = vsel %vm320_vm7, 1, %v1886_v24 }
 0x2b7   :  { %1558 = vpow2.f32 %v1480_v27  ;;  %vm333_vm4 = vcmp.gt.s32.totalorder %v2172_v7, %v322_v19 }
 0x2bc   :  { %v1557_v20 = vpop.eup %1556 }
 0x2bd   :  { %537 = vrot.lane.b32.xlu2 %v1557_v20, %s1883_s26  ;;  %v1559_v29 = vpop.eup %1558 }
 0x2be   :  { %v498_v30 = vadd.f32 1.0, %v1559_v29 }
 0x2c0   :  { %1560 = vrcp.f32 %v498_v30  ;;  %v511_v48 = vand.u32 2147483648, %v498_v30  ;;  %vm505_vm12 = vweird.f32 %v498_v30  ;;  %v509_v39 = vand.u32 2147483647, %v498_v30 }
 0x2c2   :  { %v512_v41 = vor.u32 1.1754944e-38, %v511_v48  ;;  %vm510_vm14 = vcmp.eq.f32.partialorder %v509_v39, 8.507059e+37 }
 0x2c6   :  { %v1561_v31 = vpop.eup %1560 }
 0x2c7   :  { %v501_v33 = vmul.f32 %v1561_v31, %v498_v30  ;;  %vm506_vm11 = vweird.f32 %v1561_v31 }
 0x2c8   :  { %vm507_vm13 = vmor %vm505_vm12, %vm506_vm11 }
 0x2c9   :  { %v502_v36 = vsub.f32 1.0, %v501_v33 }
 0x2cb   :  { %v503_v37 = vmul.f32 %v1561_v31, %v502_v36 }
 0x2cd   :  { %v504_v38 = vadd.f32 %v1561_v31, %v503_v37  ;;  %v243_v37 = vpop.f32.mrf.mxu0 }
 0x2cf   :  { %v508_v40 = vsel %vm507_vm13, %v1561_v31, %v504_v38  ;;  %v244_v38 = vadd.f32 %v243_v37, %v2156_v62 }
 0x2d0   :  { %v513_v43 = vsel %vm510_vm14, %v512_v41, %v508_v40 }
 0x2d1   :  { %v535_v47 = vmul.f32 %v533_v45, %v513_v43 }
 0x317   :  { %v538_v42 = vpop.permute.xlu2 %537 }
 0x318   :  { %v540_v44 = vmul.f32 %v538_v42, %v513_v43 }
 0x31a   :  { %542 = vrot.lane.b32.xlu1 %v540_v44, %s1883_s26 }
 0x38c   :  { %v543_v49 = vpop.permute.xlu1 %542 }
 0x38d   :  { %v545_v52 = vadd.f32 %v543_v49, %v535_v47 }
 0x38f   :  { %1562 = vtanh.f32 %v545_v52  ;;  %554 = vrot.lane.b32.xlu0 %v545_v52, %s1883_s26 }
 0x390   :  { %1564 = vpow2.f32 %v1481_v56 }
 0x395   :  { %v1563_v54 = vpop.eup %1562 }
 0x396   :  { %548 = vrot.lane.b32.xlu2 %v1563_v54, %s1883_s26  ;;  %v1565_v58 = vpop.eup %1564 }
 0x397   :  { %v499_v46 = vadd.f32 1.0, %v1565_v58 }
 0x399   :  { %1566 = vrcp.f32 %v499_v46  ;;  %v526_v9 = vand.u32 2147483648, %v499_v46  ;;  %vm520_vm1 = vweird.f32 %v499_v46  ;;  %v524_v18 = vand.u32 2147483647, %v499_v46 }
 0x39b   :  { %v527_v22 = vor.u32 1.1754944e-38, %v526_v9  ;;  %vm525_vm3 = vcmp.eq.f32.partialorder %v524_v18, 8.507059e+37 }
 0x39f   :  { %v1567_v60 = vpop.eup %1566 }
 0x3a0   :  { %v516_v63 = vmul.f32 %v1567_v60, %v499_v46  ;;  %vm521_vm15 = vweird.f32 %v1567_v60 }
 0x3a1   :  { %vm522_vm2 = vmor %vm520_vm1, %vm521_vm15 }
 0x3a2   :  { %v517_v2 = vsub.f32 1.0, %v516_v63 }
 0x3a4   :  { %v518_v3 = vmul.f32 %v1567_v60, %v517_v2 }
 0x3a6   :  { %v519_v5 = vadd.f32 %v1567_v60, %v518_v3 }
 0x3a8   :  { %v523_v20 = vsel %vm522_vm2, %v1567_v60, %v519_v5 }
 0x3a9   :  { %v528_v25 = vsel %vm525_vm3, %v527_v22, %v523_v20  ;;  %v1887_v20 = vmov 5  }
 0x3aa   :  { %v323_v22 = vsel %vm320_vm7, 2, %v1887_v20 }
 0x3ab   :  { %vm334_vm10 = vcmp.gt.s32.totalorder %v2172_v7, %v323_v22 }
 0x3f0   :  { %v549_v26 = vpop.permute.xlu2 %548 }
 0x3f1   :  { %v551_v27 = vmul.f32 %v549_v26, %v528_v25 }
 0x3f3   :  { %v2213_v29 = vsel %vm333_vm4, %v551_v27, %v2177_v15 }
 0x3f4   :  { %1482 = vmatmul.msk.f32.vlgmr.msrb.gmra.mxu2 %vm195_vm0, %v2213_v29  ;;  %1483 = vmatmul.msk.f32.vlgmr.msra.gmra.mxu3 %vm195_vm0, %v2213_v29 }
 0x3f5   :  { %791 = vmatpush.msra.mxu3 %v2018_v10  ;;  %902 = vmatpush.msrb.mxu2 %v2018_v10 }
 0x3f7   :  { %792 = vmatpush.msra.mxu3 %v2024_v13  ;;  %903 = vmatpush.msrb.mxu2 %v2024_v13 }
 0x3f9   :  { %793 = vmatpush.msra.mxu3 %v2030_v16  ;;  %904 = vmatpush.msrb.mxu2 %v2030_v16 }
 0x3fb   :  { %794 = vmatpush.msra.mxu3 %v2043_v21  ;;  %905 = vmatpush.msrb.mxu2 %v2043_v21 }
 0x3fd   :  { %795 = vmatpush.msra.mxu3 %v2057_v23  ;;  %906 = vmatpush.msrb.mxu2 %v2057_v23 }
 0x3ff   :  { %796 = vmatpush.msra.mxu3 %v2069_v28  ;;  %907 = vmatpush.msrb.mxu2 %v2069_v28 }
 0x401   :  { %v555_v15 = vpop.permute.xlu0 %554  ;;  %797 = vmatpush.msra.mxu3 %v2078_v34  ;;  %908 = vmatpush.msrb.mxu2 %v2078_v34 }
 0x402   :  { %v557_v30 = vsel %vm333_vm4, %v555_v15, %v2175_v12 }
 0x403   :  { %643 = vrot.lane.b32.xlu2 %v557_v30, %s1883_s26  ;;  %798 = vmatpush.msra.mxu3 %v2080_v35 }
 0x404   :  { %909 = vmatpush.msrb.mxu2 %v2080_v35 }
 0x45d   :  { %v644_v60 = vpop.permute.xlu2 %643 }
 0x477   :  { %v598_v31 = vpop.f32.mrf.mxu3  ;;  %v578_v48 = vpop.f32.mrf.mxu2 }
 0x478   :  { %v602_v33 = vadd.f32 %v598_v31, %v2144_v51  ;;  %v601_v39 = vadd.f32 %v578_v48, %v244_v38 }
 0x47a   :  { %1568 = vtanh.f32 %v602_v33  ;;  %v1484_v40 = vmul.f32 -1.442695, %v601_v39  ;;  %v1485_v9 = vmul.f32 -1.442695, %v602_v33 }
 0x47c   :  { %1570 = vpow2.f32 %v1484_v40 }
 0x480   :  { %v1569_v36 = vpop.eup %1568 }
 0x481   :  { %648 = vrot.lane.b32.xlu1 %v1569_v36, %s1883_s26 }
 0x482   :  { %v1571_v12 = vpop.eup %1570 }
 0x483   :  { %v609_v41 = vadd.f32 1.0, %v1571_v12 }
 0x485   :  { %1572 = vrcp.f32 %v609_v41  ;;  %v622_v51 = vand.u32 2147483648, %v609_v41  ;;  %vm616_vm6 = vweird.f32 %v609_v41  ;;  %v620_v49 = vand.u32 2147483647, %v609_v41 }
 0x487   :  { %v623_v54 = vor.u32 1.1754944e-38, %v622_v51  ;;  %vm621_vm9 = vcmp.eq.f32.partialorder %v620_v49, 8.507059e+37 }
 0x48b   :  { %v1573_v42 = vpop.eup %1572 }
 0x48c   :  { %v612_v43 = vmul.f32 %v1573_v42, %v609_v41  ;;  %vm617_vm5 = vweird.f32 %v1573_v42 }
 0x48d   :  { %vm618_vm8 = vmor %vm616_vm6, %vm617_vm5 }
 0x48e   :  { %v613_v44 = vsub.f32 1.0, %v612_v43 }
 0x490   :  { %v614_v45 = vmul.f32 %v1573_v42, %v613_v44 }
 0x492   :  { %v615_v47 = vadd.f32 %v1573_v42, %v614_v45 }
 0x494   :  { %v619_v52 = vsel %vm618_vm8, %v1573_v42, %v615_v47 }
 0x495   :  { %v624_v58 = vsel %vm621_vm9, %v623_v54, %v619_v52 }
 0x496   :  { %v646_v63 = vmul.f32 %v644_v60, %v624_v58 }
 0x4f3   :  { %v649_v56 = vpop.permute.xlu1 %648 }
 0x4f4   :  { %v651_v46 = vmul.f32 %v649_v56, %v624_v58 }
 0x4f6   :  { %653 = vrot.lane.b32.xlu0 %v651_v46, %s1883_s26 }
 0x568   :  { %v654_v2 = vpop.permute.xlu0 %653 }
 0x569   :  { %v656_v3 = vadd.f32 %v654_v2, %v646_v63 }
 0x56b   :  { %1574 = vtanh.f32 %v656_v3  ;;  %665 = vrot.lane.b32.xlu2 %v656_v3, %s1883_s26 }
 0x56c   :  { %1576 = vpow2.f32 %v1485_v9 }
 0x571   :  { %v1575_v5 = vpop.eup %1574 }
 0x572   :  { %659 = vrot.lane.b32.xlu1 %v1575_v5, %s1883_s26  ;;  %v1577_v18 = vpop.eup %1576 }
 0x573   :  { %v610_v24 = vadd.f32 1.0, %v1577_v18 }
 0x575   :  { %1578 = vrcp.f32 %v610_v24  ;;  %v637_v36 = vand.u32 2147483648, %v610_v24  ;;  %vm631_vm12 = vweird.f32 %v610_v24  ;;  %v635_v37 = vand.u32 2147483647, %v610_v24 }
 0x577   :  { %v638_v48 = vor.u32 1.1754944e-38, %v637_v36  ;;  %vm636_vm14 = vcmp.eq.f32.partialorder %v635_v37, 8.507059e+37 }
 0x57b   :  { %v1579_v26 = vpop.eup %1578 }
 0x57c   :  { %v627_v27 = vmul.f32 %v1579_v26, %v610_v24  ;;  %vm632_vm11 = vweird.f32 %v1579_v26 }
 0x57d   :  { %vm633_vm13 = vmor %vm631_vm12, %vm632_vm11 }
 0x57e   :  { %v628_v15 = vsub.f32 1.0, %v627_v27 }
 0x580   :  { %v629_v31 = vmul.f32 %v1579_v26, %v628_v15 }
 0x582   :  { %v630_v33 = vadd.f32 %v1579_v26, %v629_v31 }
 0x584   :  { %v634_v38 = vsel %vm633_vm13, %v1579_v26, %v630_v33  ;;  %v1888_v26 = vmov 4  }
 0x585   :  { %v639_v39 = vsel %vm636_vm14, %v638_v48, %v634_v38  ;;  %v324_v27 = vsel %vm320_vm7, 3, %v1888_v26 }
 0x586   :  { %vm335_vm4 = vcmp.gt.s32.totalorder %v2172_v7, %v324_v27 }
 0x5c5   :  { %v666_v19 = vpop.permute.xlu2 %665 }
 0x5c6   :  { %v2250_v25 = vsel %vm334_vm10, %v666_v19, %v557_v30 }
 0x5c7   :  { %754 = vrot.lane.b32.xlu1 %v2250_v25, %s1883_s26 }
 0x5e4   :  { %v660_v30 = vpop.permute.xlu1 %659 }
 0x5e5   :  { %v662_v40 = vmul.f32 %v660_v30, %v639_v39 }
 0x5e7   :  { %v2257_v12 = vsel %vm334_vm10, %v662_v40, %v2213_v29 }
 0x5e8   :  { %1486 = vmatmul.msk.f32.vlgmr.msra.gmra.mxu2 %vm195_vm0, %v2257_v12  ;;  %1487 = vmatmul.msk.f32.vlgmr.msrb.gmra.mxu3 %vm195_vm0, %v2257_v12 }
 0x5e9   :  { %922 = vmatpush.msrb.mxu3 %v2004_v0  ;;  %1124 = vmatpush.msra.mxu2 %v2018_v10 }
 0x5eb   :  { %923 = vmatpush.msrb.mxu3 %v2006_v1  ;;  %1125 = vmatpush.msra.mxu2 %v2024_v13 }
 0x5ed   :  { %924 = vmatpush.msrb.mxu3 %v2009_v4  ;;  %1126 = vmatpush.msra.mxu2 %v2030_v16 }
 0x5ef   :  { %925 = vmatpush.msrb.mxu3 %v2012_v6  ;;  %1127 = vmatpush.msra.mxu2 %v2043_v21  ;;  %v246_v21 = vpop.f32.mrf.mxu0 }
 0x5f1   :  { %926 = vmatpush.msrb.mxu3 %v2015_v8  ;;  %1128 = vmatpush.msra.mxu2 %v2057_v23  ;;  %v247_v23 = vadd.f32 %v246_v21, %v2156_v62 }
 0x5f3   :  { %927 = vmatpush.msrb.mxu3 %v2020_v11  ;;  %1129 = vmatpush.msra.mxu2 %v2069_v28 }
 0x5f5   :  { %928 = vmatpush.msrb.mxu3 %v2026_v14  ;;  %1130 = vmatpush.msra.mxu2 %v2078_v34 }
 0x5f7   :  { %929 = vmatpush.msrb.mxu3 %v2032_v17  ;;  %1131 = vmatpush.msra.mxu2 %v2080_v35 }
 0x639   :  { %v755_v46 = vpop.permute.xlu1 %754 }
 0x66b   :  { %v709_v10 = vpop.f32.mrf.mxu3  ;;  %v689_v29 = vpop.f32.mrf.mxu2 }
 0x66c   :  { %v713_v13 = vadd.f32 %v709_v10, %v2146_v53  ;;  %v712_v28 = vadd.f32 %v689_v29, %v247_v23 }
 0x66e   :  { %1580 = vtanh.f32 %v713_v13  ;;  %v1488_v41 = vmul.f32 -1.442695, %v712_v28  ;;  %v1489_v5 = vmul.f32 -1.442695, %v713_v13 }
 0x670   :  { %1582 = vpow2.f32 %v1488_v41 }
 0x674   :  { %v1581_v16 = vpop.eup %1580 }
 0x675   :  { %759 = vrot.lane.b32.xlu0 %v1581_v16, %s1883_s26 }
 0x676   :  { %v1583_v42 = vpop.eup %1582 }
 0x677   :  { %v720_v34 = vadd.f32 1.0, %v1583_v42 }
 0x679   :  { %1584 = vrcp.f32 %v720_v34  ;;  %v733_v53 = vand.u32 2147483648, %v720_v34  ;;  %vm727_vm1 = vweird.f32 %v720_v34  ;;  %v731_v51 = vand.u32 2147483647, %v720_v34 }
 0x67b   :  { %v734_v52 = vor.u32 1.1754944e-38, %v733_v53  ;;  %vm732_vm3 = vcmp.eq.f32.partialorder %v731_v51, 8.507059e+37 }
 0x67f   :  { %v1585_v43 = vpop.eup %1584 }
 0x680   :  { %v723_v44 = vmul.f32 %v1585_v43, %v720_v34  ;;  %vm728_vm15 = vweird.f32 %v1585_v43 }
 0x681   :  { %vm729_vm2 = vmor %vm727_vm1, %vm728_vm15 }
 0x682   :  { %v724_v35 = vsub.f32 1.0, %v723_v44 }
 0x684   :  { %v725_v45 = vmul.f32 %v1585_v43, %v724_v35 }
 0x686   :  { %v726_v47 = vadd.f32 %v1585_v43, %v725_v45 }
 0x688   :  { %v730_v49 = vsel %vm729_vm2, %v1585_v43, %v726_v47 }
 0x689   :  { %v735_v56 = vsel %vm732_vm3, %v734_v52, %v730_v49 }
 0x68a   :  { %v757_v60 = vmul.f32 %v755_v46, %v735_v56 }
 0x6e7   :  { %v760_v54 = vpop.permute.xlu0 %759 }
 0x6e8   :  { %v762_v58 = vmul.f32 %v760_v54, %v735_v56 }
 0x6ea   :  { %764 = vrot.lane.b32.xlu2 %v762_v58, %s1883_s26 }
 0x744   :  { %v765_v63 = vpop.permute.xlu2 %764 }
 0x745   :  { %v767_v2 = vadd.f32 %v765_v63, %v757_v60 }
 0x747   :  { %1586 = vtanh.f32 %v767_v2  ;;  %776 = vrot.lane.b32.xlu1 %v767_v2, %s1883_s26 }
 0x748   :  { %1588 = vpow2.f32 %v1489_v5 }
 0x74d   :  { %v1587_v3 = vpop.eup %1586 }
 0x74e   :  { %770 = vrot.lane.b32.xlu0 %v1587_v3, %s1883_s26  ;;  %v1589_v9 = vpop.eup %1588 }
 0x74f   :  { %v721_v18 = vadd.f32 1.0, %v1589_v9 }
 0x751   :  { %1590 = vrcp.f32 %v721_v18  ;;  %v748_v36 = vand.u32 2147483648, %v721_v18  ;;  %vm742_vm6 = vweird.f32 %v721_v18  ;;  %v746_v37 = vand.u32 2147483647, %v721_v18 }
 0x753   :  { %v749_v48 = vor.u32 1.1754944e-38, %v748_v36  ;;  %vm747_vm9 = vcmp.eq.f32.partialorder %v746_v37, 8.507059e+37 }
 0x757   :  { %v1591_v20 = vpop.eup %1590 }
 0x758   :  { %v738_v22 = vmul.f32 %v1591_v20, %v721_v18  ;;  %vm743_vm5 = vweird.f32 %v1591_v20  ;;  %v1889_v18 = vmov 3  }
 0x759   :  { %vm744_vm8 = vmor %vm742_vm6, %vm743_vm5 }
 0x75a   :  { %v739_v24 = vsub.f32 1.0, %v738_v22 }
 0x75c   :  { %v740_v19 = vmul.f32 %v1591_v20, %v739_v24 }
 0x75e   :  { %v741_v31 = vadd.f32 %v1591_v20, %v740_v19 }
 0x760   :  { %v745_v38 = vsel %vm744_vm8, %v1591_v20, %v741_v31  ;;  %v325_v20 = vsel %vm320_vm7, 4, %v1889_v18 }
 0x761   :  { %v750_v39 = vsel %vm747_vm9, %v749_v48, %v745_v38  ;;  %vm336_vm3 = vcmp.gt.s32.totalorder %v2172_v7, %v325_v20 }
 0x7b9   :  { %v777_v15 = vpop.permute.xlu1 %776 }
 0x7ba   :  { %v2289_v33 = vsel %vm335_vm4, %v777_v15, %v2250_v25 }
 0x7bb   :  { %865 = vrot.lane.b32.xlu0 %v2289_v33, %s1883_s26 }
 0x7c0   :  { %v771_v30 = vpop.permute.xlu0 %770 }
 0x7c1   :  { %v773_v40 = vmul.f32 %v771_v30, %v750_v39 }
 0x7c3   :  { %v2294_v10 = vsel %vm335_vm4, %v773_v40, %v2257_v12 }
 0x7c4   :  { %1490 = vmatmul.msk.f32.vlgmr.msra.gmra.mxu3 %vm195_vm0, %v2294_v10  ;;  %1491 = vmatmul.msk.f32.vlgmr.msra.gmra.mxu1 %vm195_vm0, %v2294_v10 }
 0x7c5   :  { %1144 = vmatpush.msra.mxu3 %v2004_v0  ;;  %v249_v0 = vpop.f32.mrf.mxu0 }
 0x7c7   :  { %1145 = vmatpush.msra.mxu3 %v2006_v1  ;;  %v250_v1 = vadd.f32 %v249_v0, %v2156_v62 }
 0x7c9   :  { %1146 = vmatpush.msra.mxu3 %v2009_v4 }
 0x7cb   :  { %1147 = vmatpush.msra.mxu3 %v2012_v6 }
 0x7cd   :  { %1148 = vmatpush.msra.mxu3 %v2015_v8  ;;  %v252_v38 = vpop.f32.mrf.mxu0 }
 0x7ce   :  { %v253_v48 = vadd.f32 %v252_v38, %v2156_v62 }
 0x7cf   :  { %1149 = vmatpush.msra.mxu3 %v2020_v11 }
 0x7d1   :  { %1150 = vmatpush.msra.mxu3 %v2026_v14 }
 0x7d3   :  { %1151 = vmatpush.msra.mxu3 %v2032_v17 }
 0x7d5   :  { %v255_v18 = vpop.f32.mrf.mxu0 }
 0x7dd   :  { %v2352_v20 = vpop.f32.mrf.mxu0 }
 0x82d   :  { %v866_v35 = vpop.permute.xlu0 %865 }
 0x841   :  { %v820_v25 = vpop.f32.mrf.mxu1 }
 0x842   :  { %v824_v12 = vadd.f32 %v820_v25, %v2148_v55 }
 0x844   :  { %1592 = vtanh.f32 %v824_v12  ;;  %v1493_v49 = vmul.f32 -1.442695, %v824_v12 }
 0x847   :  { %v800_v4 = vpop.f32.mrf.mxu3 }
 0x848   :  { %v823_v6 = vadd.f32 %v800_v4, %v250_v1 }
 0x84a   :  { %v1593_v13 = vpop.eup %1592  ;;  %v1492_v16 = vmul.f32 -1.442695, %v823_v6 }
 0x84b   :  { %870 = vrot.lane.b32.xlu2 %v1593_v13, %s1883_s26 }
 0x84c   :  { %1594 = vpow2.f32 %v1492_v16 }
 0x852   :  { %v1595_v8 = vpop.eup %1594 }
 0x853   :  { %v831_v11 = vadd.f32 1.0, %v1595_v8 }
 0x855   :  { %1596 = vrcp.f32 %v831_v11  ;;  %v844_v55 = vand.u32 2147483648, %v831_v11  ;;  %vm838_vm11 = vweird.f32 %v831_v11  ;;  %v842_v28 = vand.u32 2147483647, %v831_v11 }
 0x857   :  { %v845_v42 = vor.u32 1.1754944e-38, %v844_v55  ;;  %vm843_vm13 = vcmp.eq.f32.partialorder %v842_v28, 8.507059e+37 }
 0x85b   :  { %v1597_v14 = vpop.eup %1596 }
 0x85c   :  { %v834_v21 = vmul.f32 %v1597_v14, %v831_v11  ;;  %vm839_vm10 = vweird.f32 %v1597_v14 }
 0x85d   :  { %vm840_vm12 = vmor %vm838_vm11, %vm839_vm10 }
 0x85e   :  { %v835_v17 = vsub.f32 1.0, %v834_v21 }
 0x860   :  { %v836_v23 = vmul.f32 %v1597_v14, %v835_v17 }
 0x862   :  { %v837_v29 = vadd.f32 %v1597_v14, %v836_v23 }
 0x864   :  { %v841_v41 = vsel %vm840_vm12, %v1597_v14, %v837_v29 }
 0x865   :  { %v846_v43 = vsel %vm843_vm13, %v845_v42, %v841_v41  ;;  %v1890_v42 = vmov 2  }
 0x866   :  { %v868_v45 = vmul.f32 %v866_v35, %v846_v43 }
 0x8a5   :  { %v871_v34 = vpop.permute.xlu2 %870 }
 0x8a6   :  { %v873_v44 = vmul.f32 %v871_v34, %v846_v43  ;;  %v326_v34 = vsel %vm320_vm7, 5, %v1890_v42 }
 0x8a7   :  { %vm337_vm9 = vcmp.gt.s32.totalorder %v2172_v7, %v326_v34 }
 0x8a8   :  { %875 = vrot.lane.b32.xlu1 %v873_v44, %s1883_s26 }
 0x91a   :  { %v876_v47 = vpop.permute.xlu1 %875 }
 0x91b   :  { %v878_v53 = vadd.f32 %v876_v47, %v868_v45 }
 0x91d   :  { %1598 = vtanh.f32 %v878_v53  ;;  %887 = vrot.lane.b32.xlu0 %v878_v53, %s1883_s26 }
 0x91e   :  { %1600 = vpow2.f32 %v1493_v49 }
 0x923   :  { %v1599_v51 = vpop.eup %1598 }
 0x924   :  { %881 = vrot.lane.b32.xlu2 %v1599_v51, %s1883_s26  ;;  %v1601_v52 = vpop.eup %1600 }
 0x925   :  { %v832_v54 = vadd.f32 1.0, %v1601_v52 }
 0x927   :  { %1602 = vrcp.f32 %v832_v54  ;;  %v859_v2 = vand.u32 2147483648, %v832_v54  ;;  %vm853_vm15 = vweird.f32 %v832_v54  ;;  %v857_v3 = vand.u32 2147483647, %v832_v54 }
 0x929   :  { %v860_v9 = vor.u32 1.1754944e-38, %v859_v2  ;;  %vm858_vm2 = vcmp.eq.f32.partialorder %v857_v3, 8.507059e+37 }
 0x92d   :  { %v1603_v56 = vpop.eup %1602 }
 0x92e   :  { %v849_v58 = vmul.f32 %v1603_v56, %v832_v54  ;;  %vm854_vm14 = vweird.f32 %v1603_v56 }
 0x92f   :  { %vm855_vm1 = vmor %vm853_vm15, %vm854_vm14 }
 0x930   :  { %v850_v46 = vsub.f32 1.0, %v849_v58 }
 0x932   :  { %v851_v60 = vmul.f32 %v1603_v56, %v850_v46 }
 0x934   :  { %v852_v63 = vadd.f32 %v1603_v56, %v851_v60 }
 0x936   :  { %v856_v5 = vsel %vm855_vm1, %v1603_v56, %v852_v63 }
 0x937   :  { %v861_v22 = vsel %vm858_vm2, %v860_v9, %v856_v5 }
 0x97e   :  { %v882_v24 = vpop.permute.xlu2 %881 }
 0x97f   :  { %v884_v19 = vmul.f32 %v882_v24, %v861_v22  ;;  %v256_v22 = vadd.f32 %v255_v18, %v2156_v62 }
 0x981   :  { %v2318_v26 = vsel %vm336_vm3, %v884_v19, %v2294_v10 }
 0x982   :  { %1494 = vmatmul.msk.f32.vlgmr.msrb.gmra.mxu2 %vm195_vm0, %v2318_v26  ;;  %1495 = vmatmul.msk.f32.vlgmr.msrb.gmra.mxu3 %vm195_vm0, %v2318_v26 }
 0x98f   :  { %v888_v27 = vpop.permute.xlu0 %887 }
 0x990   :  { %v890_v15 = vsel %vm336_vm3, %v888_v27, %v2289_v33 }
 0x991   :  { %976 = vrot.lane.b32.xlu2 %v890_v15, %s1883_s26 }
 0x9eb   :  { %v977_v21 = vpop.permute.xlu2 %976 }
 0xa05   :  { %v931_v31 = vpop.f32.mrf.mxu3  ;;  %v911_v39 = vpop.f32.mrf.mxu2 }
 0xa06   :  { %v935_v36 = vadd.f32 %v931_v31, %v2150_v57  ;;  %v934_v30 = vadd.f32 %v911_v39, %v253_v48 }
 0xa08   :  { %1604 = vtanh.f32 %v935_v36  ;;  %v1496_v40 = vmul.f32 -1.442695, %v934_v30  ;;  %v1497_v28 = vmul.f32 -1.442695, %v935_v36 }
 0xa0a   :  { %1606 = vpow2.f32 %v1496_v40 }
 0xa0e   :  { %v1605_v37 = vpop.eup %1604 }
 0xa0f   :  { %981 = vrot.lane.b32.xlu1 %v1605_v37, %s1883_s26 }
 0xa10   :  { %v1607_v10 = vpop.eup %1606 }
 0xa11   :  { %v942_v25 = vadd.f32 1.0, %v1607_v10 }
 0xa13   :  { %1608 = vrcp.f32 %v942_v25  ;;  %v955_v57 = vand.u32 2147483648, %v942_v25  ;;  %vm949_vm5 = vweird.f32 %v942_v25  ;;  %v953_v4 = vand.u32 2147483647, %v942_v25 }
 0xa15   :  { %v956_v16 = vor.u32 1.1754944e-38, %v955_v57  ;;  %vm954_vm8 = vcmp.eq.f32.partialorder %v953_v4, 8.507059e+37 }
 0xa19   :  { %v1609_v33 = vpop.eup %1608 }
 0xa1a   :  { %v945_v12 = vmul.f32 %v1609_v33, %v942_v25  ;;  %vm950_vm4 = vweird.f32 %v1609_v33 }
 0xa1b   :  { %vm951_vm6 = vmor %vm949_vm5, %vm950_vm4 }
 0xa1c   :  { %v946_v13 = vsub.f32 1.0, %v945_v12 }
 0xa1e   :  { %v947_v0 = vmul.f32 %v1609_v33, %v946_v13 }
 0xa20   :  { %v948_v1 = vadd.f32 %v1609_v33, %v947_v0 }
 0xa22   :  { %v952_v6 = vsel %vm951_vm6, %v1609_v33, %v948_v1 }
 0xa23   :  { %v957_v11 = vsel %vm954_vm8, %v956_v16, %v952_v6 }
 0xa24   :  { %v979_v17 = vmul.f32 %v977_v21, %v957_v11 }
 0xa81   :  { %v982_v8 = vpop.permute.xlu1 %981 }
 0xa82   :  { %v984_v14 = vmul.f32 %v982_v8, %v957_v11 }
 0xa84   :  { %986 = vrot.lane.b32.xlu0 %v984_v14, %s1883_s26 }
 0xaf6   :  { %v987_v23 = vpop.permute.xlu0 %986 }
 0xaf7   :  { %v989_v29 = vadd.f32 %v987_v23, %v979_v17  ;;  %v1891_v17 = vmov 1  }
 0xaf8   :  { %v327_v23 = vsel %vm320_vm7, 6, %v1891_v17 }
 0xaf9   :  { %1610 = vtanh.f32 %v989_v29  ;;  %998 = vrot.lane.b32.xlu2 %v989_v29, %s1883_s26  ;;  %vm338_vm3 = vcmp.gt.s32.totalorder %v2172_v7, %v327_v23 }
 0xafa   :  { %1612 = vpow2.f32 %v1497_v28 }
 0xaff   :  { %v1611_v55 = vpop.eup %1610 }
 0xb00   :  { %992 = vrot.lane.b32.xlu1 %v1611_v55, %s1883_s26  ;;  %v1613_v41 = vpop.eup %1612 }
 0xb01   :  { %v943_v43 = vadd.f32 1.0, %v1613_v41 }
 0xb03   :  { %1614 = vrcp.f32 %v943_v43  ;;  %v970_v52 = vand.u32 2147483648, %v943_v43  ;;  %vm964_vm11 = vweird.f32 %v943_v43  ;;  %v968_v54 = vand.u32 2147483647, %v943_v43 }
 0xb05   :  { %v971_v58 = vor.u32 1.1754944e-38, %v970_v52  ;;  %vm969_vm13 = vcmp.eq.f32.partialorder %v968_v54, 8.507059e+37  ;;  %v259_v54 = vadd.f32 %v2352_v20, %v2156_v62 }
 0xb09   :  { %v1615_v45 = vpop.eup %1614 }
 0xb0a   :  { %v960_v47 = vmul.f32 %v1615_v45, %v943_v43  ;;  %vm965_vm10 = vweird.f32 %v1615_v45 }
 0xb0b   :  { %vm966_vm12 = vmor %vm964_vm11, %vm965_vm10 }
 0xb0c   :  { %v961_v53 = vsub.f32 1.0, %v960_v47 }
 0xb0e   :  { %v962_v51 = vmul.f32 %v1615_v45, %v961_v53 }
 0xb10   :  { %v963_v49 = vadd.f32 %v1615_v45, %v962_v51 }
 0xb12   :  { %v967_v56 = vsel %vm966_vm12, %v1615_v45, %v963_v49 }
 0xb13   :  { %v972_v46 = vsel %vm969_vm13, %v971_v58, %v967_v56  ;;  %vm1230_vm13 = vcmask 261120  }
 0xb53   :  { %v999_v44 = vpop.permute.xlu2 %998 }
 0xb54   :  { %v2337_v35 = vsel %vm337_vm9, %v999_v44, %v890_v15 }
 0xb55   :  { %1087 = vrot.lane.b32.xlu1 %v2337_v35, %s1883_s26 }
 0xb72   :  { %v993_v60 = vpop.permute.xlu1 %992 }
 0xb73   :  { %v995_v63 = vmul.f32 %v993_v60, %v972_v46 }
 0xb75   :  { %v2344_v2 = vsel %vm337_vm9, %v995_v63, %v2318_v26 }
 0xb76   :  { %1498 = vmatmul.msk.f32.vlgmr.msrb.gmra.mxu0 %vm195_vm0, %v2344_v2  ;;  %1499 = vmatmul.msk.f32.vlgmr.msrb.gmra.mxu1 %vm195_vm0, %v2344_v2 }
 0xbc7   :  { %v1088_v12 = vpop.permute.xlu1 %1087 }
 0xbf3   :  { %v1042_v3 = vpop.f32.mrf.mxu1  ;;  %v1022_v24 = vpop.f32.mrf.mxu0 }
 0xbf4   :  { %v1046_v5 = vadd.f32 %v1042_v3, %v2152_v59  ;;  %v1045_v19 = vadd.f32 %v1022_v24, %v256_v22 }
 0xbf6   :  { %1616 = vtanh.f32 %v1046_v5  ;;  %v1500_v26 = vmul.f32 -1.442695, %v1045_v19  ;;  %v1501_v4 = vmul.f32 -1.442695, %v1046_v5 }
 0xbf8   :  { %1618 = vpow2.f32 %v1500_v26  ;;  %v1285_v26 = vld [vmem:[#allocation13 + $0x18] sm:$0xff] }
 0xbf9   :  { %1310 = vmatpush.msra.mxu0 %v1285_v26  ;;  %v1254_v26 = vld [vmem:[#allocation7 + $0x40] sm:$0xff] }
 0xbfc   :  { %v1617_v9 = vpop.eup %1616 }
 0xbfd   :  { %1092 = vrot.lane.b32.xlu0 %v1617_v9, %s1883_s26 }
 0xbfe   :  { %v1619_v27 = vpop.eup %1618 }
 0xbff   :  { %v1053_v15 = vadd.f32 1.0, %v1619_v27  ;;  %v1284_v27 = vld [vmem:[#allocation13 + $0x10] sm:$0xff] }
 0xc00   :  { %1311 = vmatpush.msra.mxu0 %v1284_v27 }
 0xc01   :  { %1620 = vrcp.f32 %v1053_v15  ;;  %v1066_v48 = vand.u32 2147483648, %v1053_v15  ;;  %vm1060_vm15 = vweird.f32 %v1053_v15  ;;  %v1064_v39 = vand.u32 2147483647, %v1053_v15 }
 0xc03   :  { %v1067_v40 = vor.u32 1.1754944e-38, %v1066_v48  ;;  %vm1065_vm2 = vcmp.eq.f32.partialorder %v1064_v39, 8.507059e+37  ;;  %v1892_v48 = vmov 4.0  }
 0xc07   :  { %v1621_v31 = vpop.eup %1620 }
 0xc08   :  { %v1056_v36 = vmul.f32 %v1621_v31, %v1053_v15  ;;  %vm1061_vm14 = vweird.f32 %v1621_v31  ;;  %v1283_v15 = vld [vmem:[#allocation13 + $0x8] sm:$0xff] }
 0xc09   :  { %vm1062_vm1 = vmor %vm1060_vm15, %vm1061_vm14  ;;  %1312 = vmatpush.msra.mxu0 %v1283_v15 }
 0xc0a   :  { %v1057_v37 = vsub.f32 1.0, %v1056_v36 }
 0xc0c   :  { %v1058_v59 = vmul.f32 %v1621_v31, %v1057_v37 }
 0xc0e   :  { %v1059_v38 = vadd.f32 %v1621_v31, %v1058_v59 }
 0xc10   :  { %v1063_v30 = vsel %vm1062_vm1, %v1621_v31, %v1059_v38 }
 0xc11   :  { %v1068_v25 = vsel %vm1065_vm2, %v1067_v40, %v1063_v30 }
 0xc12   :  { %v1090_v13 = vmul.f32 %v1088_v12, %v1068_v25 }
 0xc6f   :  { %v1093_v10 = vpop.permute.xlu0 %1092 }
 0xc70   :  { %v1095_v33 = vmul.f32 %v1093_v10, %v1068_v25  ;;  %v1226_v10 = vld [vmem:[#allocation5] sm:$0xff]  ;;  %v1227_v25 = vld [vmem:[#allocation5 + $0x8] sm:$0xff] }
 0xc71   :  { %v1232_v12 = vsel %vm1230_vm13, %v1227_v25, 0.0 }
 0xc72   :  { %1097 = vrot.lane.b32.xlu2 %v1095_v33, %s1883_s26  ;;  %v1231_v33 = vsel %vm1230_vm13, %v1226_v10, 0.0 }
 0xccc   :  { %v1098_v0 = vpop.permute.xlu2 %1097 }
 0xccd   :  { %v1100_v1 = vadd.f32 %v1098_v0, %v1090_v13  ;;  %v1228_v0 = vld [vmem:[#allocation5 + $0x10] sm:$0xff] }
 0xccf   :  { %1622 = vtanh.f32 %v1100_v1  ;;  %1109 = vrot.lane.b32.xlu1 %v1100_v1, %s1883_s26  ;;  %v1233_v1 = vadd.f32 %v1232_v12, %v1231_v33 }
 0xcd0   :  { %1624 = vpow2.f32 %v1501_v4 }
 0xcd5   :  { %v1623_v57 = vpop.eup %1622 }
 0xcd6   :  { %1103 = vrot.lane.b32.xlu0 %v1623_v57, %s1883_s26  ;;  %v1625_v6 = vpop.eup %1624  ;;  %v1234_v57 = vsel %vm1230_vm13, %v1228_v0, 0.0 }
 0xcd7   :  { %v1054_v16 = vadd.f32 1.0, %v1625_v6 }
 0xcd9   :  { %1626 = vrcp.f32 %v1054_v16  ;;  %v1081_v41 = vand.u32 2147483648, %v1054_v16  ;;  %vm1075_vm5 = vweird.f32 %v1054_v16  ;;  %v1079_v42 = vand.u32 2147483647, %v1054_v16 }
 0xcdb   :  { %v1082_v43 = vor.u32 1.1754944e-38, %v1081_v41  ;;  %vm1080_vm8 = vcmp.eq.f32.partialorder %v1079_v42, 8.507059e+37  ;;  %v1249_v41 = vld [vmem:[#allocation7 + $0x18] sm:$0xff] }
 0xcdf   :  { %v1627_v8 = vpop.eup %1626 }
 0xce0   :  { %v1071_v11 = vmul.f32 %v1627_v8, %v1054_v16  ;;  %vm1076_vm4 = vweird.f32 %v1627_v8  ;;  %v1229_v16 = vld [vmem:[#allocation5 + $0x18] sm:$0xff] }
 0xce1   :  { %vm1077_vm6 = vmor %vm1075_vm5, %vm1076_vm4 }
 0xce2   :  { %v1072_v14 = vsub.f32 1.0, %v1071_v11  ;;  %v1236_v11 = vsel %vm1230_vm13, %v1229_v16, 0.0 }
 0xce4   :  { %v1073_v21 = vmul.f32 %v1627_v8, %v1072_v14 }
 0xce6   :  { %v1074_v55 = vadd.f32 %v1627_v8, %v1073_v21 }
 0xce8   :  { %v1078_v34 = vsel %vm1077_vm6, %v1627_v8, %v1074_v55  ;;  %v1235_v8 = vadd.f32 %v1234_v57, %v1233_v1  ;;  %v328_v57 = vsel %vm320_vm7, 7, %v1884_v32  ;;  %vm1436_vm7 = vcmask 785408  }
 0xce9   :  { %v1083_v44 = vsel %vm1080_vm8, %v1082_v43, %v1078_v34  ;;  %v1259_v34 = vsel %vm1230_vm13, %v1249_v41, 0.0  ;;  %v1252_v43 = vld [vmem:[#allocation7 + $0x30] sm:$0xff]  ;;  %vm339_vm4 = vcmp.gt.s32.totalorder %v2172_v7, %v328_v57 }
 0xcea   :  { %v1237_v21 = vadd.f32 %v1236_v11, %v1235_v8  ;;  %v1328_v11 = vld [vmem:[#allocation11 + $0x8] sm:$0xff] }
 0xd41   :  { %v1110_v29 = vpop.permute.xlu1 %1109 }
 0xd42   :  { %v1112_v28 = vsel %vm338_vm3, %v1110_v29, %v2337_v35  ;;  %v1282_v29 = vld [vmem:[#allocation13] sm:$0xff] }
 0xd43   :  { %1198 = vrot.lane.b32.xlu0 %v1112_v28, %s1883_s26  ;;  %v1246_v28 = vld [vmem:[#allocation7] sm:$0xff]  ;;  %1313 = vmatpush.msra.mxu0 %v1282_v29 }
 0xd44   :  { %v1258_v42 = vsel %vm1230_vm13, %v1246_v28, 0.0 }
 0xd48   :  { %v1104_v45 = vpop.permute.xlu0 %1103 }
 0xd49   :  { %v1106_v47 = vmul.f32 %v1104_v45, %v1083_v44  ;;  %v1260_v44 = vadd.f32 %v1259_v34, %v1258_v42  ;;  %v1255_v45 = vld [vmem:[#allocation7 + $0x48] sm:$0xff] }
 0xd4b   :  { %v2364_v53 = vsel %vm338_vm3, %v1106_v47, %v2344_v2  ;;  %v1261_v47 = vsel %vm1230_vm13, %v1252_v43, 0.0 }
 0xd4c   :  { %1502 = vmatmul.msk.f32.vlgmr.msra.gmra.mxu2 %vm195_vm0, %v2364_v53  ;;  %1503 = vmatmul.msk.f32.vlgmr.msra.gmra.mxu3 %vm195_vm0, %v2364_v53 }
 0xdb5   :  { %v1199_v31 = vpop.permute.xlu0 %1198 }
 0xdcf   :  { %v1153_v35 = vpop.f32.mrf.mxu3  ;;  %v1133_v52 = vpop.f32.mrf.mxu2 }
 0xdd0   :  { %v1157_v51 = vadd.f32 %v1153_v35, %v2154_v61  ;;  %v1156_v56 = vadd.f32 %v1133_v52, %v259_v54  ;;  %v1247_v35 = vld [vmem:[#allocation7 + $0x8] sm:$0xff]  ;;  %v1263_v52 = vsel %vm1230_vm13, %v1255_v45, 0.0  ;;  %v1253_v54 = vld [vmem:[#allocation7 + $0x38] sm:$0xff]  ;;  %v1379_v45 = vld [vmem:[#allocation14 + $0x10] sm:$0xff] }
 0xdd2   :  { %1628 = vtanh.f32 %v1157_v51  ;;  %v1504_v58 = vmul.f32 -1.442695, %v1156_v56  ;;  %v1505_v39 = vmul.f32 -1.442695, %v1157_v51  ;;  %v1250_v51 = vld [vmem:[#allocation7 + $0x20] sm:$0xff]  ;;  %v1256_v56 = vld [vmem:[#allocation7 + $0x50] sm:$0xff] }
 0xdd4   :  { %1630 = vpow2.f32 %v1504_v58  ;;  %v1265_v58 = vsel %vm1230_vm13, %v1247_v35, 0.0  ;;  %v1377_v35 = vld [vmem:[#allocation14] sm:$0xff] }
 0xdd8   :  { %v1629_v49 = vpop.eup %1628 }
 0xdd9   :  { %1203 = vrot.lane.b32.xlu2 %v1629_v49, %s1883_s26  ;;  %v1262_v49 = vadd.f32 %v1261_v47, %v1260_v44  ;;  %v1380_v44 = vld [vmem:[#allocation14 + $0x18] sm:$0xff]  ;;  %v1378_v47 = vld [vmem:[#allocation14 + $0x8] sm:$0xff] }
 0xdda   :  { %v1631_v46 = vpop.eup %1630  ;;  %1402 = vmatpush.msrb.mxu2 %v1380_v44 }
 0xddb   :  { %v1164_v60 = vadd.f32 1.0, %v1631_v46  ;;  %v1266_v46 = vsel %vm1230_vm13, %v1250_v51, 0.0 }
 0xddc   :  { %1403 = vmatpush.msrb.mxu2 %v1379_v45 }
 0xddd   :  { %1632 = vrcp.f32 %v1164_v60  ;;  %v1177_v61 = vand.u32 2147483648, %v1164_v60  ;;  %vm1171_vm10 = vweird.f32 %v1164_v60  ;;  %v1175_v18 = vand.u32 2147483647, %v1164_v60 }
 0xdde   :  { %1404 = vmatpush.msrb.mxu2 %v1378_v47 }
 0xddf   :  { %v1178_v24 = vor.u32 1.1754944e-38, %v1177_v61  ;;  %vm1176_vm12 = vcmp.eq.f32.partialorder %v1175_v18, 8.507059e+37  ;;  %v1330_v61 = vld [vmem:[#allocation11 + $0x18] sm:$0xff] }
 0xde0   :  { %1346 = vmatpush.msra.mxu1 %v1330_v61  ;;  %1405 = vmatpush.msrb.mxu2 %v1377_v35 }
 0xde3   :  { %v1633_v63 = vpop.eup %1632 }
 0xde4   :  { %v1167_v2 = vmul.f32 %v1633_v63, %v1164_v60  ;;  %vm1172_vm9 = vweird.f32 %v1633_v63  ;;  %v1248_v60 = vld [vmem:[#allocation7 + $0x10] sm:$0xff] }
 0xde5   :  { %vm1173_vm11 = vmor %vm1171_vm10, %vm1172_vm9 }
 0xde6   :  { %v1168_v3 = vsub.f32 1.0, %v1167_v2  ;;  %v1268_v2 = vsel %vm1230_vm13, %v1253_v54, 0.0 }
 0xde8   :  { %v1169_v5 = vmul.f32 %v1633_v63, %v1168_v3  ;;  %v1251_v3 = vld [vmem:[#allocation7 + $0x28] sm:$0xff] }
 0xdea   :  { %v1170_v9 = vadd.f32 %v1633_v63, %v1169_v5  ;;  %v1264_v5 = vadd.f32 %v1263_v52, %v1262_v49 }
 0xdec   :  { %v1174_v22 = vsel %vm1173_vm11, %v1633_v63, %v1170_v9  ;;  %v1267_v63 = vadd.f32 %v1266_v46, %v1265_v58  ;;  %v2394_v9 = vld [vmem:[%s2443_s10] ss:$0 sm:$0xff]  ;;  %s1894_s10 = smov 32  }
 0xded   :  { %v1179_v20 = vsel %vm1176_vm12, %v1178_v24, %v1174_v22  ;;  %v1270_v22 = vsel %vm1230_vm13, %v1256_v56, 0.0  ;;  %v1272_v24 = vsel %vm1230_vm13, %v1248_v60, 0.0 }
 0xdee   :  { %v1201_v36 = vmul.f32 %v1199_v31, %v1179_v20  ;;  %v1269_v18 = vadd.f32 %v1268_v2, %v1267_v63 }
 0xdf0   :  { %v1271_v15 = vadd.f32 %v1270_v22, %v1269_v18 }
 0xe33   :  { %v1204_v62 = vpop.permute.xlu2 %1203 }
 0xe34   :  { %v1206_v19 = vmul.f32 %v1204_v62, %v1179_v20  ;;  %v1273_v62 = vsel %vm1230_vm13, %v1251_v3, 0.0  ;;  %v1329_v20 = vld [vmem:[#allocation11 + $0x10] sm:$0xff] }
 0xe35   :  { %1347 = vmatpush.msra.mxu1 %v1329_v20  ;;  %v1274_v31 = vadd.f32 %v1273_v62, %v1272_v24 }
 0xe36   :  { %1208 = vrot.lane.b32.xlu1 %v1206_v19, %s1883_s26 }
 0xe37   :  { %1348 = vmatpush.msra.mxu1 %v1328_v11 }
 0xe3e   :  { %1359 = vrot.lane.b32.xlu1 %v2394_v9, %s1893_s18 }
 0xea8   :  { %v1209_v37 = vpop.permute.xlu1 %1208 }
 0xea9   :  { %v1211_v59 = vadd.f32 %v1209_v37, %v1201_v36  ;;  %v1275_v36 = vsel %vm1230_vm13, %v1254_v26, 0.0 }
 0xeab   :  { %1634 = vtanh.f32 %v1211_v59  ;;  %v1257_v59 = vld [vmem:[#allocation7 + $0x58] sm:$0xff] }
 0xeac   :  { %1636 = vrcp.f32 %v1892_v48  ;;  %v1276_v48 = vadd.f32 %v1275_v36, %v1274_v31 }
 0xead   :  { %1638 = vpow2.f32 %v1505_v39  ;;  %v1277_v39 = vsel %vm1230_vm13, %v1257_v59, 0.0 }
 0xeb1   :  { %v1635_v38 = vpop.eup %1634 }
 0xeb2   :  { %1214 = vrot.lane.b32.xlu2 %v1635_v38, %s1883_s26  ;;  %v1637_v30 = vpop.eup %1636 }
 0xeb3   :  { %v1239_v40 = vmul.f32 4.0, %v1637_v30  ;;  %v1639_v6 = vpop.eup %1638  ;;  %vm1243_vm14 = vweird.f32 %v1637_v30 }
 0xeb4   :  { %v2380_v17 = vadd.f32 1.0, %v1639_v6 }
 0xeb5   :  { %v1240_v13 = vsub.f32 1.0, %v1239_v40  ;;  %v1278_v40 = vadd.f32 %v1277_v39, %v1276_v48 }
 0xeb6   :  { %1640 = vrcp.f32 %v2380_v17  ;;  %v1192_v12 = vand.u32 2147483648, %v2380_v17  ;;  %vm1186_vm1 = vweird.f32 %v2380_v17 }
 0xeb7   :  { %v1241_v4 = vmul.f32 %v1637_v30, %v1240_v13  ;;  %v1190_v13 = vand.u32 2147483647, %v2380_v17 }
 0xeb8   :  { %v1193_v1 = vor.u32 1.1754944e-38, %v1192_v12 }
 0xeb9   :  { %v1242_v14 = vadd.f32 %v1637_v30, %v1241_v4  ;;  %vm1191_vm3 = vcmp.eq.f32.partialorder %v1190_v13, 8.507059e+37 }
 0xebb   :  { %v1244_v23 = vsel %vm1243_vm14, %v1637_v30, %v1242_v14  ;;  %v1327_v14 = vld [vmem:[#allocation11] sm:$0xff] }
 0xebc   :  { %v1245_v55 = vmul.f32 %v1244_v23, %v1237_v21  ;;  %v1279_v19 = vmul.f32 %v1264_v5, %v1244_v23  ;;  %v1641_v27 = vpop.eup %1640  ;;  %v1280_v38 = vmul.f32 %v1271_v15, %v1244_v23  ;;  %v1281_v25 = vmul.f32 %v1278_v40, %v1244_v23  ;;  %1349 = vmatpush.msra.mxu1 %v1327_v14 }
 0xebd   :  { %v1182_v37 = vmul.f32 %v1641_v27, %v2380_v17  ;;  %vm1187_vm15 = vweird.f32 %v1641_v27  ;;  %v1360_v17 = vpop.permute.xlu1 %1359 }
 0xebe   :  { %1506 = vmatmul.msk.f32.vlgmr.msra.gmra.mxu0 %vm1230_vm13, %v1245_v55  ;;  %vm1188_vm2 = vmor %vm1186_vm1, %vm1187_vm15 }
 0xebf   :  { %v1183_v30 = vsub.f32 1.0, %v1182_v37 }
 0xec1   :  { %v1184_v10 = vmul.f32 %v1641_v27, %v1183_v30 }
 0xec3   :  { %v1185_v33 = vadd.f32 %v1641_v27, %v1184_v10 }
 0xec5   :  { %v1189_v0 = vsel %vm1188_vm2, %v1641_v27, %v1185_v33 }
 0xec6   :  { %1507 = vmatmul.msk.f32.gmra.mxu0 %vm1230_vm13, %v1279_v19  ;;  %v1194_v4 = vsel %vm1191_vm3, %v1193_v1, %v1189_v0 }
 0xece   :  { %1508 = vmatmul.msk.f32.gmra.mxu0 %vm1230_vm13, %v1280_v38 }
 0xed6   :  { %1509 = vmatmul.msk.f32.gmra.mxu0 %vm1230_vm13, %v1281_v25 }
 0xf0c   :  { %v1215_v6 = vpop.permute.xlu2 %1214 }
 0xf0d   :  { %v1217_v16 = vmul.f32 %v1215_v6, %v1194_v4 }
 0xf0f   :  { %v1218_v8 = vsel %vm339_vm4, %v1217_v16, %v2364_v53 }
 0xf10   :  { %1220 = vrot.lane.b32.xlu0 %v1218_v8, %s1893_s18 }
 0xf3b   :  { %v1315_v21 = vpop.f32.mrf.mxu0 }
 0xf43   :  { %v1318_v23 = vpop.f32.mrf.mxu0 }
 0xf44   :  { %v1362_v29 = vadd.f32 %v1360_v17, %v1318_v23 }
 0xf46   :  { %v1365_v50 = vmax.f32 %v1362_v29, 0.0 }
 0xf48   :  { %1371 = vrot.lane.b32.xlu2 %v1365_v50, %s1893_s18 }
 0xf4b   :  { %v1321_v32 = vpop.f32.mrf.mxu0 }
 0xf4c   :  { %v1363_v55 = vadd.f32 %v1360_v17, %v1321_v32 }
 0xf4e   :  { %v1366_v28 = vmax.f32 %v1363_v55, 0.0 }
 0xf50   :  { %1373 = vrot.lane.b32.xlu0 %v1366_v28, %s1893_s18  ;;  %1420 = vrot.lane.b32.xlu2 %v2394_v9, %s1883_s26 }
 0xf53   :  { %v1324_v41 = vpop.f32.mrf.mxu0 }
 0xf54   :  { %v1364_v34 = vadd.f32 %v1360_v17, %v1324_v41 }
 0xf56   :  { %v1367_v43 = vmax.f32 %v1364_v34, 0.0 }
 0xf58   :  { %1375 = vrot.lane.b32.xlu1 %v1367_v43, %s1893_s18 }
 0xf82   :  { %v1221_v7 = vpop.permute.xlu0 %1220 }
 0xf83   :  { %v1223_v53 = vadd.f32 %v1221_v7, %v1218_v8 }
 0xf85   :  { %v1224_v42 = vmul.f32 0.5, %v1223_v53 }
 0xf87   :  { %1510 = vmatmul.msk.f32.vlgmr.msra.gmra.mxu1 %vm1230_vm13, %v1224_v42 }
 0xfa2   :  { %v1372_v56 = vpop.permute.xlu2 %1371 }
 0xfaa   :  { %v1421_v63 = vpop.permute.xlu2 %1420 }
 0xfc2   :  { %v1374_v58 = vpop.permute.xlu0 %1373 }
 0xfca   :  { %v1376_v46 = vpop.permute.xlu1 %1375 }
0x1004   :  { %v1351_v51 = vpop.f32.mrf.mxu1 }
0x1005   :  { %v1352_v49 = vadd.f32 %v1351_v51, %v1315_v21 }
0x1007   :  { %v1357_v52 = vadd.f32 %v2394_v9, %v1352_v49 }
0x1009   :  { %v1358_v54 = vmax.f32 %v1357_v52, 0.0 }
0x100b   :  { %1511 = vmatmul.msk.f32.vlgmr.msrb.gmra.mxu2 %vm1230_vm13, %v1358_v54 }
0x1013   :  { %1512 = vmatmul.msk.f32.gmra.mxu2 %vm1230_vm13, %v1372_v56 }
0x101b   :  { %1513 = vmatmul.msk.f32.gmra.mxu2 %vm1230_vm13, %v1374_v58 }
0x1023   :  { %1514 = vmatmul.msk.f32.gmra.mxu2 %vm1230_vm13, %v1376_v46 }
0x108e   :  { %v1407_v60 = vpop.f32.mrf.mxu2 }
0x108f   :  { %v1419_v3 = vadd.f32 %v1407_v60, %v1360_v17 }
0x1096   :  { %v1410_v2 = vpop.f32.mrf.mxu2 }
0x1097   :  { %v1423_v5 = vadd.f32 %v1421_v63, %v1410_v2 }
0x1099   :  { %v1434_v61 = vsel %vm1230_vm13, %v1419_v3, %v1423_v5 }
0x109e   :  { %v1413_v9 = vpop.f32.mrf.mxu2 }
0x109f   :  { %v1424_v18 = vadd.f32 %v1421_v63, %v1413_v9 }
0x10a1   :  { %1427 = vrot.lane.b32.xlu0 %v1424_v18, %s1894_s10 }
0x10a6   :  { %v1416_v22 = vpop.f32.mrf.mxu2 }
0x10a7   :  { %v1425_v24 = vadd.f32 %v1421_v63, %v1416_v22 }
0x10a9   :  { %1431 = vrot.lane.b32.xlu1 %v1425_v24, %s1883_s26 }
0x1113   :  { %v1428_v62 = vpop.permute.xlu0 %1427 }
0x1114   :  { %v1435_v20 = vsel %vm195_vm0, %v1434_v61, %v1428_v62 }
0x111b   :  { %v1432_v19 = vpop.permute.xlu1 %1431 }
0x111c   :  { %v1437_v26 = vsel %vm1436_vm7, %v1435_v20, %v1432_v19 }
0x111d   :  { %1438 = vst [vmem:[#allocation16] sm:$0xff] %v1437_v26 }
0x111e   :  { %1449 = dma.vmem_to_hbm [thread:$0]  %s1445_s20, 128, %s1447_s7, [#allocation4]  }
0x111f   :  { %1868 = dma.done.wait [#allocation4], 128  }
0x1120   :  { %1869 = vsyncadd [#allocation4], 4294967168 }
0x1121   :  { %1454 = vsyncpa [#allocation3], 1 }
0x1122   :  { %1455 = vsyncpa [#allocation6], 1 }
0x1123   :  { %1456 = vsyncpa [#allocation9], 1 }
0x1124   :  { %1457 = vsyncpa [#allocation12], 1 }
0x1125   :  { %1458 = vsyncpa [#allocation15], 1 }
0x1126   :  { %1459 = vsyncpa [#allocation4], 1 }

</bundles_post_ra>
